<compile_context>
chip_gen: v6e
topology: v6e:2x2x1
jax: 0.10.0
libtpu: 0.0.40
codegen_flags: <defaults>
</compile_context>

<pallas_src>
import math

import jax
import jax.numpy as jnp
from jax.experimental import pallas as pl
from jax.experimental.pallas import tpu as pltpu

# ---- model hyper-parameters (small, consistent with the module ctor) --------
NTOKEN = 100
D_MODEL = 32
NHEAD = 4
D_HID = 64
NLAYERS = 2
MAX_LEN = 256
LN_EPS = 1e-5  # PyTorch TransformerEncoderLayer default layer_norm_eps
DH = D_MODEL // NHEAD

_PARAMS_PER_LAYER = 12  # wqkv, bqkv, wo, bo, w1, b1, w2, b2, g1, be1, g2, be2

# Matmul-operand dtype.  bf16 halves weight DMA bytes and runs the MXU at its
# bf16 rate on v6e/v7x; kept f32 at this toy size so the correctness check
# against the f32 reference stays tight (flip to jnp.bfloat16 when scaling).
MATMUL_DTYPE = jnp.float32


# =============================================================================
# Pallas kernel: one grid step == one batch element, all layers fused
# =============================================================================
def _layer_norm(y, g, b):
    mu = jnp.mean(y, axis=-1, keepdims=True)
    var = jnp.mean((y - mu) * (y - mu), axis=-1, keepdims=True)
    return (y - mu) * jax.lax.rsqrt(var + LN_EPS) * g + b


def _encoder_kernel(emb_ref, pe_ref, mask_ref, *refs):
    """Per-batch fused forward.

    emb_ref : [S, D]  token embeddings for this batch element
    pe_ref  : [S, D]  positional encoding (resident, same for every grid step)
    mask_ref: [S, S]  additive src_mask (resident)
    refs    : NLAYERS * 12 parameter refs (resident) followed by the [S, D] out ref
    """
    out_ref = refs[-1]
    params = refs[:-1]

    H, dh = NHEAD, DH
    S = emb_ref.shape[0]

    # positional encoding fused into the kernel (no separate launch)
    x = emb_ref[...] * math.sqrt(D_MODEL) + pe_ref[...]          # [S, D]
    mask = mask_ref[...]                                          # [S, S]

    for l in range(NLAYERS):                                      # static layer loop
        (wqkv, bqkv, wo, bo, w1, b1, w2, b2,
         g1, be1, g2, be2) = params[l * _PARAMS_PER_LAYER:
                                    (l + 1) * _PARAMS_PER_LAYER]

        # ---- multi-head self attention -----------------------------------
        # Single fused QKV projection per layer (Wq already carries 1/sqrt(dh)).
        xh = jnp.broadcast_to(x[None], (H, S, D_MODEL))           # [H, S, D]
        qkv = jnp.einsum('hnd,hdk->hnk', xh, wqkv[...],
                         preferred_element_type=jnp.float32) + bqkv[...]  # [H, S, 3dh]
        q = qkv[:, :, 0:dh]
        k = qkv[:, :, dh:2 * dh]
        v = qkv[:, :, 2 * dh:3 * dh]

        s = jnp.einsum('hqd,hkd->hqk', q, k,
                       preferred_element_type=jnp.float32) + mask[None]   # [H, S, S]
        s = s - jnp.max(s, axis=-1, keepdims=True)
        p = jnp.exp(s)
        denom = jnp.sum(p, axis=-1, keepdims=True)
        r = pl.reciprocal(denom, approx=True)                      # EUP slot
        r = r * (2.0 - denom * r)                                  # one Newton step
        p = p * r

        ctx = jnp.einsum('hqk,hkd->hqd', p, v,
                         preferred_element_type=jnp.float32)       # [H, S, dh]
        proj = jnp.einsum('hnd,hdm->hnm', ctx, wo[...],
                          preferred_element_type=jnp.float32)      # [H, S, D]
        attn = jnp.sum(proj, axis=0) + bo[...]                     # sum over heads == concat @ Wo

        # ---- post-norm residual blocks ------------------------------------
        x1 = _layer_norm(x + attn, g1[...], be1[...])
        hid = jnp.maximum(
            jnp.dot(x1, w1[...], preferred_element_type=jnp.float32) + b1[...], 0.0)
        ff = jnp.dot(hid, w2[...], preferred_element_type=jnp.float32) + b2[...]
        x = _layer_norm(x1 + ff, g2[...], be2[...])

    out_ref[...] = x.astype(out_ref.dtype)


# =============================================================================
# Wrapper
# =============================================================================
def _prep_layer_params(layer):
    """Canonical [in, out] weights / 1-D biases -> fused head-major kernel layout."""
    (wq, bq, wk, bk, wv, bv, wo, bo, w1, b1, w2, b2, g1, be1, g2, be2) = layer
    scale = 1.0 / math.sqrt(DH)

    def w_h(w):  # [D, D] -> [H, D, dh]
        return jnp.transpose(w.reshape(D_MODEL, NHEAD, DH), (1, 0, 2))

    def b_h(b):  # [D] -> [H, 1, dh]
        return b.reshape(NHEAD, 1, DH)

    # fold the attention scale into Wq / bq; fuse q,k,v along the last dim
    wqkv = jnp.concatenate([w_h(wq) * scale, w_h(wk), w_h(wv)], axis=-1)   # [H, D, 3dh]
    bqkv = jnp.concatenate([b_h(bq) * scale, b_h(bk), b_h(bv)], axis=-1)   # [H, 1, 3dh]

    return [wqkv.astype(MATMUL_DTYPE), bqkv,
            wo.reshape(NHEAD, DH, D_MODEL).astype(MATMUL_DTYPE),           # [H, dh, D]
            bo.reshape(1, D_MODEL),
            w1.astype(MATMUL_DTYPE), b1.reshape(1, D_HID),
            w2.astype(MATMUL_DTYPE), b2.reshape(1, D_MODEL),
            g1.reshape(1, D_MODEL), be1.reshape(1, D_MODEL),
            g2.reshape(1, D_MODEL), be2.reshape(1, D_MODEL)]


def transformer_embedding_forward(src, src_mask, emb_table, pe, layer_params):
    """src: [S, B] int32, src_mask: [S, S] additive float -> [S, B, D]."""
    S, B = src.shape

    # TODO(synk): the token-id gather stays in XLA (jnp.take); an in-kernel
    # scalar-prefetch/Element gather only pays off at realistic vocab / d_model.
    emb = jnp.take(emb_table, src.T, axis=0)                    # [B, S, D]
    pe_s = pe[:S, 0, :]                                         # [S, D]
    mask = src_mask.astype(jnp.float32)                         # [S, S]
    # TODO(synk): src_mask is a runtime input of the module, so it is not
    # synthesized in-kernel via iota (that would hard-code causal semantics).

    kparams = []
    for layer in layer_params:
        kparams.extend(_prep_layer_params(layer))

    def resident(arr):  # full-array block, same block index every grid step
        nd = arr.ndim
        return pl.BlockSpec(arr.shape, lambda b, _nd=nd: (0,) * _nd)

    in_specs = [
        pl.BlockSpec((None, S, D_MODEL), lambda b: (b, 0, 0)),  # per-batch embeddings
        pl.BlockSpec((S, D_MODEL), lambda b: (0, 0)),           # PE (resident)
        pl.BlockSpec((S, S), lambda b: (0, 0)),                 # src_mask (resident)
    ] + [resident(p) for p in kparams]

    out = pl.pallas_call(
        _encoder_kernel,
        grid=(B,),
        in_specs=in_specs,
        out_specs=pl.BlockSpec((None, S, D_MODEL), lambda b: (b, 0, 0)),
        out_shape=jax.ShapeDtypeStruct((B, S, D_MODEL), jnp.float32),
        compiler_params=pltpu.CompilerParams(
            dimension_semantics=("parallel",)),
    )(emb, pe_s, mask, *kparams)

    return jnp.transpose(out, (1, 0, 2))                        # [S, B, D]


# =============================================================================
# Deterministic parameter construction (synthetic; no checkpoint loading)
# =============================================================================
def build_pe(d_model, max_len):
    position = jnp.arange(max_len, dtype=jnp.float32)[:, None]
    div_term = jnp.exp(jnp.arange(0, d_model, 2, dtype=jnp.float32)
                       * (-math.log(10000.0) / d_model))
    pe = jnp.zeros((max_len, 1, d_model), jnp.float32)
    pe = pe.at[:, 0, 0::2].set(jnp.sin(position * div_term))
    pe = pe.at[:, 0, 1::2].set(jnp.cos(position * div_term))
    return pe


def init_params(key):
    keys = jax.random.split(key, 1 + NLAYERS)
    emb_table = jax.random.uniform(keys[0], (NTOKEN, D_MODEL), jnp.float32, -0.1, 0.1)
    layers = []
    s = 0.05
    for l in range(NLAYERS):
        ks = jax.random.split(keys[1 + l], 12)
        wq = jax.random.normal(ks[0], (D_MODEL, D_MODEL), jnp.float32) * s
        wk = jax.random.normal(ks[1], (D_MODEL, D_MODEL), jnp.float32) * s
        wv = jax.random.normal(ks[2], (D_MODEL, D_MODEL), jnp.float32) * s
        bq = jax.random.normal(ks[3], (D_MODEL,), jnp.float32) * 0.01
        bk = jax.random.normal(ks[4], (D_MODEL,), jnp.float32) * 0.01
        bv = jax.random.normal(ks[5], (D_MODEL,), jnp.float32) * 0.01
        wo = jax.random.normal(ks[6], (D_MODEL, D_MODEL), jnp.float32) * s
        bo = jax.random.normal(ks[7], (D_MODEL,), jnp.float32) * 0.01
        w1 = jax.random.normal(ks[8], (D_MODEL, D_HID), jnp.float32) * s
        b1 = jax.random.normal(ks[9], (D_HID,), jnp.float32) * 0.01
        w2 = jax.random.normal(ks[10], (D_HID, D_MODEL), jnp.float32) * s
        b2 = jax.random.normal(ks[11], (D_MODEL,), jnp.float32) * 0.01
        g1 = jnp.ones((D_MODEL,), jnp.float32)
        be1 = jnp.zeros((D_MODEL,), jnp.float32)
        g2 = jnp.ones((D_MODEL,), jnp.float32)
        be2 = jnp.zeros((D_MODEL,), jnp.float32)
        layers.append((wq, bq, wk, bk, wv, bv, wo, bo,
                       w1, b1, w2, b2, g1, be1, g2, be2))
    return emb_table, layers


# =============================================================================
# Pure-JAX reference (mirrors PyTorch semantics) for a correctness check
# =============================================================================
def reference_forward(src, src_mask, emb_table, pe, layer_params):
    S, B = src.shape
    x = jnp.take(emb_table, src, axis=0) * math.sqrt(D_MODEL) + pe[:S]
    x = jnp.transpose(x, (1, 0, 2))                           # [B, S, D]
    dh = D_MODEL // NHEAD
    for (wq, bq, wk, bk, wv, bv, wo, bo,
         w1, b1, w2, b2, g1, be1, g2, be2) in layer_params:
        q = x @ wq + bq
        k = x @ wk + bk
        v = x @ wv + bv
        qh = q.reshape(B, S, NHEAD, dh).transpose(0, 2, 1, 3)
        kh = k.reshape(B, S, NHEAD, dh).transpose(0, 2, 1, 3)
        vh = v.reshape(B, S, NHEAD, dh).transpose(0, 2, 1, 3)
        scores = jnp.einsum('bhqd,bhkd->bhqk', qh, kh) / math.sqrt(dh) + src_mask
        p = jax.nn.softmax(scores, axis=-1)
        ctx = jnp.einsum('bhqk,bhkd->bhqd', p, vh).transpose(0, 2, 1, 3)
        ctx = ctx.reshape(B, S, D_MODEL)
        attn = ctx @ wo + bo

        def ln(y, g, b_):
            mu = y.mean(-1, keepdims=True)
            var = ((y - mu) ** 2).mean(-1, keepdims=True)
            return (y - mu) / jnp.sqrt(var + LN_EPS) * g + b_

        x = ln(x + attn, g1, be1)
        ff = jax.nn.relu(x @ w1 + b1) @ w2 + b2
        x = ln(x + ff, g2, be2)
    return jnp.transpose(x, (1, 0, 2))


# =============================================================================
if __name__ == "__main__":
    key = jax.random.PRNGKey(0)
    k_params, k_src = jax.random.split(key)

    emb_table, layer_params = init_params(k_params)
    pe = build_pe(D_MODEL, MAX_LEN)

    S, B = 8, 2
    src = jax.random.randint(k_src, (S, B), 0, NTOKEN, dtype=jnp.int32)
    causal = jnp.tril(jnp.ones((S, S), dtype=bool))
    src_mask = jnp.where(causal, 0.0, -1e9).astype(jnp.float32)

    out = transformer_embedding_forward(src, src_mask, emb_table, pe, layer_params)
    out = jax.block_until_ready(out)
    assert out.shape == (S, B, D_MODEL), out.shape

    ref = reference_forward(src, src_mask, emb_table, pe, layer_params)
    if not jnp.allclose(out, ref, atol=5e-3, rtol=5e-3):
        max_err = float(jnp.max(jnp.abs(out - ref)))
        raise AssertionError(f"Pallas output mismatch vs reference, max abs err={max_err}")

    print("KERNEL_OK")
</pallas_src>

<mosaic_0001>
module attributes {stable_mosaic.version = 11 : i64} {
  func.func @_encoder_kernel(%arg0: i32, %arg1: memref<1x8x32xf32, #tpu.memory_space<vmem>>, %arg2: memref<8x32xf32, #tpu.memory_space<vmem>>, %arg3: memref<8x8xf32, #tpu.memory_space<vmem>>, %arg4: memref<4x32x24xf32, #tpu.memory_space<vmem>>, %arg5: memref<4x1x24xf32, #tpu.memory_space<vmem>>, %arg6: memref<4x8x32xf32, #tpu.memory_space<vmem>>, %arg7: memref<1x32xf32, #tpu.memory_space<vmem>>, %arg8: memref<32x64xf32, #tpu.memory_space<vmem>>, %arg9: memref<1x64xf32, #tpu.memory_space<vmem>>, %arg10: memref<64x32xf32, #tpu.memory_space<vmem>>, %arg11: memref<1x32xf32, #tpu.memory_space<vmem>>, %arg12: memref<1x32xf32, #tpu.memory_space<vmem>>, %arg13: memref<1x32xf32, #tpu.memory_space<vmem>>, %arg14: memref<1x32xf32, #tpu.memory_space<vmem>>, %arg15: memref<1x32xf32, #tpu.memory_space<vmem>>, %arg16: memref<4x32x24xf32, #tpu.memory_space<vmem>>, %arg17: memref<4x1x24xf32, #tpu.memory_space<vmem>>, %arg18: memref<4x8x32xf32, #tpu.memory_space<vmem>>, %arg19: memref<1x32xf32, #tpu.memory_space<vmem>>, %arg20: memref<32x64xf32, #tpu.memory_space<vmem>>, %arg21: memref<1x64xf32, #tpu.memory_space<vmem>>, %arg22: memref<64x32xf32, #tpu.memory_space<vmem>>, %arg23: memref<1x32xf32, #tpu.memory_space<vmem>>, %arg24: memref<1x32xf32, #tpu.memory_space<vmem>>, %arg25: memref<1x32xf32, #tpu.memory_space<vmem>>, %arg26: memref<1x32xf32, #tpu.memory_space<vmem>>, %arg27: memref<1x32xf32, #tpu.memory_space<vmem>>, %arg28: memref<1x8x32xf32, #tpu.memory_space<vmem>>) attributes {dimension_semantics = [#tpu.dimension_semantics<parallel>], iteration_bounds = array<i64: 2>, scalar_prefetch = 0 : i64, scratch_operands = 0 : i64, tpu.core_type = #tpu.core_type<tc>, window_params = [{transform_indices = @transform_0, window_bounds = array<i64: 1, 8, 32>}, {pipeline_mode = #tpu.pipeline_mode<synchronous>, transform_indices = @transform_1, window_bounds = array<i64: 8, 32>}, {pipeline_mode = #tpu.pipeline_mode<synchronous>, transform_indices = @transform_2, window_bounds = array<i64: 8, 8>}, {pipeline_mode = #tpu.pipeline_mode<synchronous>, transform_indices = @transform_3, window_bounds = array<i64: 4, 32, 24>}, {pipeline_mode = #tpu.pipeline_mode<synchronous>, transform_indices = @transform_4, window_bounds = array<i64: 4, 1, 24>}, {pipeline_mode = #tpu.pipeline_mode<synchronous>, transform_indices = @transform_5, window_bounds = array<i64: 4, 8, 32>}, {pipeline_mode = #tpu.pipeline_mode<synchronous>, transform_indices = @transform_6, window_bounds = array<i64: 1, 32>}, {pipeline_mode = #tpu.pipeline_mode<synchronous>, transform_indices = @transform_7, window_bounds = array<i64: 32, 64>}, {pipeline_mode = #tpu.pipeline_mode<synchronous>, transform_indices = @transform_8, window_bounds = array<i64: 1, 64>}, {pipeline_mode = #tpu.pipeline_mode<synchronous>, transform_indices = @transform_9, window_bounds = array<i64: 64, 32>}, {pipeline_mode = #tpu.pipeline_mode<synchronous>, transform_indices = @transform_10, window_bounds = array<i64: 1, 32>}, {pipeline_mode = #tpu.pipeline_mode<synchronous>, transform_indices = @transform_11, window_bounds = array<i64: 1, 32>}, {pipeline_mode = #tpu.pipeline_mode<synchronous>, transform_indices = @transform_12, window_bounds = array<i64: 1, 32>}, {pipeline_mode = #tpu.pipeline_mode<synchronous>, transform_indices = @transform_13, window_bounds = array<i64: 1, 32>}, {pipeline_mode = #tpu.pipeline_mode<synchronous>, transform_indices = @transform_14, window_bounds = array<i64: 1, 32>}, {pipeline_mode = #tpu.pipeline_mode<synchronous>, transform_indices = @transform_15, window_bounds = array<i64: 4, 32, 24>}, {pipeline_mode = #tpu.pipeline_mode<synchronous>, transform_indices = @transform_16, window_bounds = array<i64: 4, 1, 24>}, {pipeline_mode = #tpu.pipeline_mode<synchronous>, transform_indices = @transform_17, window_bounds = array<i64: 4, 8, 32>}, {pipeline_mode = #tpu.pipeline_mode<synchronous>, transform_indices = @transform_18, window_bounds = array<i64: 1, 32>}, {pipeline_mode = #tpu.pipeline_mode<synchronous>, transform_indices = @transform_19, window_bounds = array<i64: 32, 64>}, {pipeline_mode = #tpu.pipeline_mode<synchronous>, transform_indices = @transform_20, window_bounds = array<i64: 1, 64>}, {pipeline_mode = #tpu.pipeline_mode<synchronous>, transform_indices = @transform_21, window_bounds = array<i64: 64, 32>}, {pipeline_mode = #tpu.pipeline_mode<synchronous>, transform_indices = @transform_22, window_bounds = array<i64: 1, 32>}, {pipeline_mode = #tpu.pipeline_mode<synchronous>, transform_indices = @transform_23, window_bounds = array<i64: 1, 32>}, {pipeline_mode = #tpu.pipeline_mode<synchronous>, transform_indices = @transform_24, window_bounds = array<i64: 1, 32>}, {pipeline_mode = #tpu.pipeline_mode<synchronous>, transform_indices = @transform_25, window_bounds = array<i64: 1, 32>}, {pipeline_mode = #tpu.pipeline_mode<synchronous>, transform_indices = @transform_26, window_bounds = array<i64: 1, 32>}, {transform_indices = @transform_27, window_bounds = array<i64: 1, 8, 32>}]} {
    %c0 = arith.constant 0 : index
    %c0_0 = arith.constant 0 : index
    %c0_1 = arith.constant 0 : index
    %0 = vector.load %arg1[%c0, %c0_0, %c0_1] : memref<1x8x32xf32, #tpu.memory_space<vmem>>, vector<1x8x32xf32>
    %1 = vector.shape_cast %0 : vector<1x8x32xf32> to vector<8x32xf32>
    %cst = arith.constant 5.65685415 : f32
    %2 = vector.broadcast %cst : f32 to vector<8x32xf32>
    %3 = arith.mulf %1, %2 : vector<8x32xf32>
    %c0_2 = arith.constant 0 : index
    %c0_3 = arith.constant 0 : index
    %4 = vector.load %arg2[%c0_2, %c0_3] : memref<8x32xf32, #tpu.memory_space<vmem>>, vector<8x32xf32>
    %5 = arith.addf %3, %4 : vector<8x32xf32>
    %c0_4 = arith.constant 0 : index
    %c0_5 = arith.constant 0 : index
    %6 = vector.load %arg3[%c0_4, %c0_5] : memref<8x8xf32, #tpu.memory_space<vmem>>, vector<8x8xf32>
    %7 = vector.shape_cast %5 : vector<8x32xf32> to vector<1x8x32xf32>
    %8 = vector.shape_cast %7 : vector<1x8x32xf32> to vector<1x8x32xf32>
    %9 = vector.broadcast %8 : vector<1x8x32xf32> to vector<4x8x32xf32>
    %c0_6 = arith.constant 0 : index
    %c0_7 = arith.constant 0 : index
    %c0_8 = arith.constant 0 : index
    %10 = vector.load %arg4[%c0_6, %c0_7, %c0_8] : memref<4x32x24xf32, #tpu.memory_space<vmem>>, vector<4x32x24xf32>
    "tpu.trace_start"() <{level = 10 : i32, message = "hnd,hdk->hnk"}> : () -> ()
    %cst_9 = arith.constant dense<0.000000e+00> : vector<4x8x24xf32>
    %11 = tpu.matmul %9, %10, %cst_9 {dimension_numbers = #tpu.dot_dimension_numbers<[2], [1], [1], [2], [0, 0, 0, 1, 1, 2], [0], [0]>} : vector<4x8x32xf32>, vector<4x32x24xf32>, vector<4x8x24xf32> -> vector<4x8x24xf32>
    "tpu.trace_stop"() : () -> ()
    %c0_10 = arith.constant 0 : index
    %c0_11 = arith.constant 0 : index
    %c0_12 = arith.constant 0 : index
    %12 = vector.load %arg5[%c0_10, %c0_11, %c0_12] : memref<4x1x24xf32, #tpu.memory_space<vmem>>, vector<4x1x24xf32>
    %13 = vector.broadcast %12 : vector<4x1x24xf32> to vector<4x8x24xf32>
    %14 = arith.addf %11, %13 : vector<4x8x24xf32>
    %15 = vector.extract_strided_slice %14 {offsets = [0, 0, 0], sizes = [4, 8, 8], strides = [1, 1, 1]} : vector<4x8x24xf32> to vector<4x8x8xf32>
    %16 = vector.extract_strided_slice %14 {offsets = [0, 0, 8], sizes = [4, 8, 8], strides = [1, 1, 1]} : vector<4x8x24xf32> to vector<4x8x8xf32>
    %17 = vector.extract_strided_slice %14 {offsets = [0, 0, 16], sizes = [4, 8, 8], strides = [1, 1, 1]} : vector<4x8x24xf32> to vector<4x8x8xf32>
    "tpu.trace_start"() <{level = 10 : i32, message = "hqd,hkd->hqk"}> : () -> ()
    %cst_13 = arith.constant dense<0.000000e+00> : vector<4x8x8xf32>
    %18 = tpu.matmul %15, %16, %cst_13 {dimension_numbers = #tpu.dot_dimension_numbers<[2], [2], [1], [1], [0, 0, 0, 1, 1, 1], [0], [0]>} : vector<4x8x8xf32>, vector<4x8x8xf32>, vector<4x8x8xf32> -> vector<4x8x8xf32>
    "tpu.trace_stop"() : () -> ()
    %19 = vector.shape_cast %6 : vector<8x8xf32> to vector<1x8x8xf32>
    %20 = vector.broadcast %19 : vector<1x8x8xf32> to vector<4x8x8xf32>
    %21 = arith.addf %18, %20 : vector<4x8x8xf32>
    %cst_14 = arith.constant dense<0xFF800000> : vector<4x8xf32>
    %22 = vector.multi_reduction <maximumf>, %21, %cst_14 [2] : vector<4x8x8xf32> to vector<4x8xf32>
    %23 = vector.shape_cast %22 : vector<4x8xf32> to vector<4x8x1xf32>
    %24 = vector.broadcast %23 : vector<4x8x1xf32> to vector<4x8x8xf32>
    %25 = arith.subf %21, %24 : vector<4x8x8xf32>
    %26 = math.exp %25 : vector<4x8x8xf32>
    %cst_15 = arith.constant dense<0.000000e+00> : vector<4x8xf32>
    %27 = vector.multi_reduction <add>, %26, %cst_15 [2] : vector<4x8x8xf32> to vector<4x8xf32>
    %28 = vector.shape_cast %27 : vector<4x8xf32> to vector<4x8x1xf32>
    %29 = tpu.reciprocal %28 {approx = true} : vector<4x8x1xf32> -> vector<4x8x1xf32>
    %30 = arith.mulf %28, %29 : vector<4x8x1xf32>
    %cst_16 = arith.constant 2.000000e+00 : f32
    %31 = vector.broadcast %cst_16 : f32 to vector<4x8x1xf32>
    %32 = arith.subf %31, %30 : vector<4x8x1xf32>
    %33 = arith.mulf %29, %32 : vector<4x8x1xf32>
    %34 = vector.broadcast %33 : vector<4x8x1xf32> to vector<4x8x8xf32>
    %35 = arith.mulf %26, %34 : vector<4x8x8xf32>
    "tpu.trace_start"() <{level = 10 : i32, message = "hqk,hkd->hqd"}> : () -> ()
    %cst_17 = arith.constant dense<0.000000e+00> : vector<4x8x8xf32>
    %36 = tpu.matmul %35, %17, %cst_17 {dimension_numbers = #tpu.dot_dimension_numbers<[2], [1], [1], [2], [0, 0, 0, 1, 1, 2], [0], [0]>} : vector<4x8x8xf32>, vector<4x8x8xf32>, vector<4x8x8xf32> -> vector<4x8x8xf32>
    "tpu.trace_stop"() : () -> ()
    %c0_18 = arith.constant 0 : index
    %c0_19 = arith.constant 0 : index
    %c0_20 = arith.constant 0 : index
    %37 = vector.load %arg6[%c0_18, %c0_19, %c0_20] : memref<4x8x32xf32, #tpu.memory_space<vmem>>, vector<4x8x32xf32>
    "tpu.trace_start"() <{level = 10 : i32, message = "hnd,hdm->hnm"}> : () -> ()
    %cst_21 = arith.constant dense<0.000000e+00> : vector<4x8x32xf32>
    %38 = tpu.matmul %36, %37, %cst_21 {dimension_numbers = #tpu.dot_dimension_numbers<[2], [1], [1], [2], [0, 0, 0, 1, 1, 2], [0], [0]>} : vector<4x8x8xf32>, vector<4x8x32xf32>, vector<4x8x32xf32> -> vector<4x8x32xf32>
    "tpu.trace_stop"() : () -> ()
    %cst_22 = arith.constant dense<0.000000e+00> : vector<8x32xf32>
    %39 = vector.multi_reduction <add>, %38, %cst_22 [0] : vector<4x8x32xf32> to vector<8x32xf32>
    %c0_23 = arith.constant 0 : index
    %c0_24 = arith.constant 0 : index
    %40 = vector.load %arg7[%c0_23, %c0_24] : memref<1x32xf32, #tpu.memory_space<vmem>>, vector<1x32xf32>
    %41 = vector.broadcast %40 : vector<1x32xf32> to vector<8x32xf32>
    %42 = arith.addf %39, %41 : vector<8x32xf32>
    %43 = arith.addf %5, %42 : vector<8x32xf32>
    %c0_25 = arith.constant 0 : index
    %c0_26 = arith.constant 0 : index
    %44 = vector.load %arg12[%c0_25, %c0_26] : memref<1x32xf32, #tpu.memory_space<vmem>>, vector<1x32xf32>
    %c0_27 = arith.constant 0 : index
    %c0_28 = arith.constant 0 : index
    %45 = vector.load %arg13[%c0_27, %c0_28] : memref<1x32xf32, #tpu.memory_space<vmem>>, vector<1x32xf32>
    %cst_29 = arith.constant dense<0.000000e+00> : vector<8xf32>
    %46 = vector.multi_reduction <add>, %43, %cst_29 [1] : vector<8x32xf32> to vector<8xf32>
    %47 = vector.shape_cast %46 : vector<8xf32> to vector<8x1xf32>
    %cst_30 = arith.constant 3.200000e+01 : f32
    %48 = vector.broadcast %cst_30 : f32 to vector<8x1xf32>
    %49 = arith.divf %47, %48 : vector<8x1xf32>
    %50 = vector.broadcast %49 : vector<8x1xf32> to vector<8x32xf32>
    %51 = arith.subf %43, %50 : vector<8x32xf32>
    %52 = vector.broadcast %49 : vector<8x1xf32> to vector<8x32xf32>
    %53 = arith.subf %43, %52 : vector<8x32xf32>
    %54 = arith.mulf %51, %53 : vector<8x32xf32>
    %cst_31 = arith.constant dense<0.000000e+00> : vector<8xf32>
    %55 = vector.multi_reduction <add>, %54, %cst_31 [1] : vector<8x32xf32> to vector<8xf32>
    %56 = vector.shape_cast %55 : vector<8xf32> to vector<8x1xf32>
    %cst_32 = arith.constant 3.200000e+01 : f32
    %57 = vector.broadcast %cst_32 : f32 to vector<8x1xf32>
    %58 = arith.divf %56, %57 : vector<8x1xf32>
    %59 = vector.broadcast %49 : vector<8x1xf32> to vector<8x32xf32>
    %60 = arith.subf %43, %59 : vector<8x32xf32>
    %cst_33 = arith.constant 9.99999974E-6 : f32
    %61 = vector.broadcast %cst_33 : f32 to vector<8x1xf32>
    %62 = arith.addf %58, %61 : vector<8x1xf32>
    %63 = math.rsqrt %62 : vector<8x1xf32>
    %64 = vector.broadcast %63 : vector<8x1xf32> to vector<8x32xf32>
    %65 = arith.mulf %60, %64 : vector<8x32xf32>
    %66 = vector.broadcast %44 : vector<1x32xf32> to vector<8x32xf32>
    %67 = arith.mulf %65, %66 : vector<8x32xf32>
    %68 = vector.broadcast %45 : vector<1x32xf32> to vector<8x32xf32>
    %69 = arith.addf %67, %68 : vector<8x32xf32>
    %c0_34 = arith.constant 0 : index
    %c0_35 = arith.constant 0 : index
    %70 = vector.load %arg8[%c0_34, %c0_35] : memref<32x64xf32, #tpu.memory_space<vmem>>, vector<32x64xf32>
    %cst_36 = arith.constant dense<0.000000e+00> : vector<8x64xf32>
    %71 = tpu.matmul %69, %70, %cst_36 {dimension_numbers = #tpu.dot_dimension_numbers<[1], [0], [0], [1], [0, 0, 1, 1], [], []>} : vector<8x32xf32>, vector<32x64xf32>, vector<8x64xf32> -> vector<8x64xf32>
    %c0_37 = arith.constant 0 : index
    %c0_38 = arith.constant 0 : index
    %72 = vector.load %arg9[%c0_37, %c0_38] : memref<1x64xf32, #tpu.memory_space<vmem>>, vector<1x64xf32>
    %73 = vector.broadcast %72 : vector<1x64xf32> to vector<8x64xf32>
    %74 = arith.addf %71, %73 : vector<8x64xf32>
    %cst_39 = arith.constant 0.000000e+00 : f32
    %75 = vector.broadcast %cst_39 : f32 to vector<8x64xf32>
    %76 = arith.maximumf %74, %75 : vector<8x64xf32>
    %c0_40 = arith.constant 0 : index
    %c0_41 = arith.constant 0 : index
    %77 = vector.load %arg10[%c0_40, %c0_41] : memref<64x32xf32, #tpu.memory_space<vmem>>, vector<64x32xf32>
    %cst_42 = arith.constant dense<0.000000e+00> : vector<8x32xf32>
    %78 = tpu.matmul %76, %77, %cst_42 {dimension_numbers = #tpu.dot_dimension_numbers<[1], [0], [0], [1], [0, 0, 1, 1], [], []>} : vector<8x64xf32>, vector<64x32xf32>, vector<8x32xf32> -> vector<8x32xf32>
    %c0_43 = arith.constant 0 : index
    %c0_44 = arith.constant 0 : index
    %79 = vector.load %arg11[%c0_43, %c0_44] : memref<1x32xf32, #tpu.memory_space<vmem>>, vector<1x32xf32>
    %80 = vector.broadcast %79 : vector<1x32xf32> to vector<8x32xf32>
    %81 = arith.addf %78, %80 : vector<8x32xf32>
    %82 = arith.addf %69, %81 : vector<8x32xf32>
    %c0_45 = arith.constant 0 : index
    %c0_46 = arith.constant 0 : index
    %83 = vector.load %arg14[%c0_45, %c0_46] : memref<1x32xf32, #tpu.memory_space<vmem>>, vector<1x32xf32>
    %c0_47 = arith.constant 0 : index
    %c0_48 = arith.constant 0 : index
    %84 = vector.load %arg15[%c0_47, %c0_48] : memref<1x32xf32, #tpu.memory_space<vmem>>, vector<1x32xf32>
    %cst_49 = arith.constant dense<0.000000e+00> : vector<8xf32>
    %85 = vector.multi_reduction <add>, %82, %cst_49 [1] : vector<8x32xf32> to vector<8xf32>
    %86 = vector.shape_cast %85 : vector<8xf32> to vector<8x1xf32>
    %cst_50 = arith.constant 3.200000e+01 : f32
    %87 = vector.broadcast %cst_50 : f32 to vector<8x1xf32>
    %88 = arith.divf %86, %87 : vector<8x1xf32>
    %89 = vector.broadcast %88 : vector<8x1xf32> to vector<8x32xf32>
    %90 = arith.subf %82, %89 : vector<8x32xf32>
    %91 = vector.broadcast %88 : vector<8x1xf32> to vector<8x32xf32>
    %92 = arith.subf %82, %91 : vector<8x32xf32>
    %93 = arith.mulf %90, %92 : vector<8x32xf32>
    %cst_51 = arith.constant dense<0.000000e+00> : vector<8xf32>
    %94 = vector.multi_reduction <add>, %93, %cst_51 [1] : vector<8x32xf32> to vector<8xf32>
    %95 = vector.shape_cast %94 : vector<8xf32> to vector<8x1xf32>
    %cst_52 = arith.constant 3.200000e+01 : f32
    %96 = vector.broadcast %cst_52 : f32 to vector<8x1xf32>
    %97 = arith.divf %95, %96 : vector<8x1xf32>
    %98 = vector.broadcast %88 : vector<8x1xf32> to vector<8x32xf32>
    %99 = arith.subf %82, %98 : vector<8x32xf32>
    %cst_53 = arith.constant 9.99999974E-6 : f32
    %100 = vector.broadcast %cst_53 : f32 to vector<8x1xf32>
    %101 = arith.addf %97, %100 : vector<8x1xf32>
    %102 = math.rsqrt %101 : vector<8x1xf32>
    %103 = vector.broadcast %102 : vector<8x1xf32> to vector<8x32xf32>
    %104 = arith.mulf %99, %103 : vector<8x32xf32>
    %105 = vector.broadcast %83 : vector<1x32xf32> to vector<8x32xf32>
    %106 = arith.mulf %104, %105 : vector<8x32xf32>
    %107 = vector.broadcast %84 : vector<1x32xf32> to vector<8x32xf32>
    %108 = arith.addf %106, %107 : vector<8x32xf32>
    %109 = vector.shape_cast %108 : vector<8x32xf32> to vector<1x8x32xf32>
    %110 = vector.shape_cast %109 : vector<1x8x32xf32> to vector<1x8x32xf32>
    %111 = vector.broadcast %110 : vector<1x8x32xf32> to vector<4x8x32xf32>
    %c0_54 = arith.constant 0 : index
    %c0_55 = arith.constant 0 : index
    %c0_56 = arith.constant 0 : index
    %112 = vector.load %arg16[%c0_54, %c0_55, %c0_56] : memref<4x32x24xf32, #tpu.memory_space<vmem>>, vector<4x32x24xf32>
    "tpu.trace_start"() <{level = 10 : i32, message = "hnd,hdk->hnk"}> : () -> ()
    %cst_57 = arith.constant dense<0.000000e+00> : vector<4x8x24xf32>
    %113 = tpu.matmul %111, %112, %cst_57 {dimension_numbers = #tpu.dot_dimension_numbers<[2], [1], [1], [2], [0, 0, 0, 1, 1, 2], [0], [0]>} : vector<4x8x32xf32>, vector<4x32x24xf32>, vector<4x8x24xf32> -> vector<4x8x24xf32>
    "tpu.trace_stop"() : () -> ()
    %c0_58 = arith.constant 0 : index
    %c0_59 = arith.constant 0 : index
    %c0_60 = arith.constant 0 : index
    %114 = vector.load %arg17[%c0_58, %c0_59, %c0_60] : memref<4x1x24xf32, #tpu.memory_space<vmem>>, vector<4x1x24xf32>
    %115 = vector.broadcast %114 : vector<4x1x24xf32> to vector<4x8x24xf32>
    %116 = arith.addf %113, %115 : vector<4x8x24xf32>
    %117 = vector.extract_strided_slice %116 {offsets = [0, 0, 0], sizes = [4, 8, 8], strides = [1, 1, 1]} : vector<4x8x24xf32> to vector<4x8x8xf32>
    %118 = vector.extract_strided_slice %116 {offsets = [0, 0, 8], sizes = [4, 8, 8], strides = [1, 1, 1]} : vector<4x8x24xf32> to vector<4x8x8xf32>
    %119 = vector.extract_strided_slice %116 {offsets = [0, 0, 16], sizes = [4, 8, 8], strides = [1, 1, 1]} : vector<4x8x24xf32> to vector<4x8x8xf32>
    "tpu.trace_start"() <{level = 10 : i32, message = "hqd,hkd->hqk"}> : () -> ()
    %cst_61 = arith.constant dense<0.000000e+00> : vector<4x8x8xf32>
    %120 = tpu.matmul %117, %118, %cst_61 {dimension_numbers = #tpu.dot_dimension_numbers<[2], [2], [1], [1], [0, 0, 0, 1, 1, 1], [0], [0]>} : vector<4x8x8xf32>, vector<4x8x8xf32>, vector<4x8x8xf32> -> vector<4x8x8xf32>
    "tpu.trace_stop"() : () -> ()
    %121 = vector.shape_cast %6 : vector<8x8xf32> to vector<1x8x8xf32>
    %122 = vector.broadcast %121 : vector<1x8x8xf32> to vector<4x8x8xf32>
    %123 = arith.addf %120, %122 : vector<4x8x8xf32>
    %cst_62 = arith.constant dense<0xFF800000> : vector<4x8xf32>
    %124 = vector.multi_reduction <maximumf>, %123, %cst_62 [2] : vector<4x8x8xf32> to vector<4x8xf32>
    %125 = vector.shape_cast %124 : vector<4x8xf32> to vector<4x8x1xf32>
    %126 = vector.broadcast %125 : vector<4x8x1xf32> to vector<4x8x8xf32>
    %127 = arith.subf %123, %126 : vector<4x8x8xf32>
    %128 = math.exp %127 : vector<4x8x8xf32>
    %cst_63 = arith.constant dense<0.000000e+00> : vector<4x8xf32>
    %129 = vector.multi_reduction <add>, %128, %cst_63 [2] : vector<4x8x8xf32> to vector<4x8xf32>
    %130 = vector.shape_cast %129 : vector<4x8xf32> to vector<4x8x1xf32>
    %131 = tpu.reciprocal %130 {approx = true} : vector<4x8x1xf32> -> vector<4x8x1xf32>
    %132 = arith.mulf %130, %131 : vector<4x8x1xf32>
    %cst_64 = arith.constant 2.000000e+00 : f32
    %133 = vector.broadcast %cst_64 : f32 to vector<4x8x1xf32>
    %134 = arith.subf %133, %132 : vector<4x8x1xf32>
    %135 = arith.mulf %131, %134 : vector<4x8x1xf32>
    %136 = vector.broadcast %135 : vector<4x8x1xf32> to vector<4x8x8xf32>
    %137 = arith.mulf %128, %136 : vector<4x8x8xf32>
    "tpu.trace_start"() <{level = 10 : i32, message = "hqk,hkd->hqd"}> : () -> ()
    %cst_65 = arith.constant dense<0.000000e+00> : vector<4x8x8xf32>
    %138 = tpu.matmul %137, %119, %cst_65 {dimension_numbers = #tpu.dot_dimension_numbers<[2], [1], [1], [2], [0, 0, 0, 1, 1, 2], [0], [0]>} : vector<4x8x8xf32>, vector<4x8x8xf32>, vector<4x8x8xf32> -> vector<4x8x8xf32>
    "tpu.trace_stop"() : () -> ()
    %c0_66 = arith.constant 0 : index
    %c0_67 = arith.constant 0 : index
    %c0_68 = arith.constant 0 : index
    %139 = vector.load %arg18[%c0_66, %c0_67, %c0_68] : memref<4x8x32xf32, #tpu.memory_space<vmem>>, vector<4x8x32xf32>
    "tpu.trace_start"() <{level = 10 : i32, message = "hnd,hdm->hnm"}> : () -> ()
    %cst_69 = arith.constant dense<0.000000e+00> : vector<4x8x32xf32>
    %140 = tpu.matmul %138, %139, %cst_69 {dimension_numbers = #tpu.dot_dimension_numbers<[2], [1], [1], [2], [0, 0, 0, 1, 1, 2], [0], [0]>} : vector<4x8x8xf32>, vector<4x8x32xf32>, vector<4x8x32xf32> -> vector<4x8x32xf32>
    "tpu.trace_stop"() : () -> ()
    %cst_70 = arith.constant dense<0.000000e+00> : vector<8x32xf32>
    %141 = vector.multi_reduction <add>, %140, %cst_70 [0] : vector<4x8x32xf32> to vector<8x32xf32>
    %c0_71 = arith.constant 0 : index
    %c0_72 = arith.constant 0 : index
    %142 = vector.load %arg19[%c0_71, %c0_72] : memref<1x32xf32, #tpu.memory_space<vmem>>, vector<1x32xf32>
    %143 = vector.broadcast %142 : vector<1x32xf32> to vector<8x32xf32>
    %144 = arith.addf %141, %143 : vector<8x32xf32>
    %145 = arith.addf %108, %144 : vector<8x32xf32>
    %c0_73 = arith.constant 0 : index
    %c0_74 = arith.constant 0 : index
    %146 = vector.load %arg24[%c0_73, %c0_74] : memref<1x32xf32, #tpu.memory_space<vmem>>, vector<1x32xf32>
    %c0_75 = arith.constant 0 : index
    %c0_76 = arith.constant 0 : index
    %147 = vector.load %arg25[%c0_75, %c0_76] : memref<1x32xf32, #tpu.memory_space<vmem>>, vector<1x32xf32>
    %cst_77 = arith.constant dense<0.000000e+00> : vector<8xf32>
    %148 = vector.multi_reduction <add>, %145, %cst_77 [1] : vector<8x32xf32> to vector<8xf32>
    %149 = vector.shape_cast %148 : vector<8xf32> to vector<8x1xf32>
    %cst_78 = arith.constant 3.200000e+01 : f32
    %150 = vector.broadcast %cst_78 : f32 to vector<8x1xf32>
    %151 = arith.divf %149, %150 : vector<8x1xf32>
    %152 = vector.broadcast %151 : vector<8x1xf32> to vector<8x32xf32>
    %153 = arith.subf %145, %152 : vector<8x32xf32>
    %154 = vector.broadcast %151 : vector<8x1xf32> to vector<8x32xf32>
    %155 = arith.subf %145, %154 : vector<8x32xf32>
    %156 = arith.mulf %153, %155 : vector<8x32xf32>
    %cst_79 = arith.constant dense<0.000000e+00> : vector<8xf32>
    %157 = vector.multi_reduction <add>, %156, %cst_79 [1] : vector<8x32xf32> to vector<8xf32>
    %158 = vector.shape_cast %157 : vector<8xf32> to vector<8x1xf32>
    %cst_80 = arith.constant 3.200000e+01 : f32
    %159 = vector.broadcast %cst_80 : f32 to vector<8x1xf32>
    %160 = arith.divf %158, %159 : vector<8x1xf32>
    %161 = vector.broadcast %151 : vector<8x1xf32> to vector<8x32xf32>
    %162 = arith.subf %145, %161 : vector<8x32xf32>
    %cst_81 = arith.constant 9.99999974E-6 : f32
    %163 = vector.broadcast %cst_81 : f32 to vector<8x1xf32>
    %164 = arith.addf %160, %163 : vector<8x1xf32>
    %165 = math.rsqrt %164 : vector<8x1xf32>
    %166 = vector.broadcast %165 : vector<8x1xf32> to vector<8x32xf32>
    %167 = arith.mulf %162, %166 : vector<8x32xf32>
    %168 = vector.broadcast %146 : vector<1x32xf32> to vector<8x32xf32>
    %169 = arith.mulf %167, %168 : vector<8x32xf32>
    %170 = vector.broadcast %147 : vector<1x32xf32> to vector<8x32xf32>
    %171 = arith.addf %169, %170 : vector<8x32xf32>
    %c0_82 = arith.constant 0 : index
    %c0_83 = arith.constant 0 : index
    %172 = vector.load %arg20[%c0_82, %c0_83] : memref<32x64xf32, #tpu.memory_space<vmem>>, vector<32x64xf32>
    %cst_84 = arith.constant dense<0.000000e+00> : vector<8x64xf32>
    %173 = tpu.matmul %171, %172, %cst_84 {dimension_numbers = #tpu.dot_dimension_numbers<[1], [0], [0], [1], [0, 0, 1, 1], [], []>} : vector<8x32xf32>, vector<32x64xf32>, vector<8x64xf32> -> vector<8x64xf32>
    %c0_85 = arith.constant 0 : index
    %c0_86 = arith.constant 0 : index
    %174 = vector.load %arg21[%c0_85, %c0_86] : memref<1x64xf32, #tpu.memory_space<vmem>>, vector<1x64xf32>
    %175 = vector.broadcast %174 : vector<1x64xf32> to vector<8x64xf32>
    %176 = arith.addf %173, %175 : vector<8x64xf32>
    %cst_87 = arith.constant 0.000000e+00 : f32
    %177 = vector.broadcast %cst_87 : f32 to vector<8x64xf32>
    %178 = arith.maximumf %176, %177 : vector<8x64xf32>
    %c0_88 = arith.constant 0 : index
    %c0_89 = arith.constant 0 : index
    %179 = vector.load %arg22[%c0_88, %c0_89] : memref<64x32xf32, #tpu.memory_space<vmem>>, vector<64x32xf32>
    %cst_90 = arith.constant dense<0.000000e+00> : vector<8x32xf32>
    %180 = tpu.matmul %178, %179, %cst_90 {dimension_numbers = #tpu.dot_dimension_numbers<[1], [0], [0], [1], [0, 0, 1, 1], [], []>} : vector<8x64xf32>, vector<64x32xf32>, vector<8x32xf32> -> vector<8x32xf32>
    %c0_91 = arith.constant 0 : index
    %c0_92 = arith.constant 0 : index
    %181 = vector.load %arg23[%c0_91, %c0_92] : memref<1x32xf32, #tpu.memory_space<vmem>>, vector<1x32xf32>
    %182 = vector.broadcast %181 : vector<1x32xf32> to vector<8x32xf32>
    %183 = arith.addf %180, %182 : vector<8x32xf32>
    %184 = arith.addf %171, %183 : vector<8x32xf32>
    %c0_93 = arith.constant 0 : index
    %c0_94 = arith.constant 0 : index
    %185 = vector.load %arg26[%c0_93, %c0_94] : memref<1x32xf32, #tpu.memory_space<vmem>>, vector<1x32xf32>
    %c0_95 = arith.constant 0 : index
    %c0_96 = arith.constant 0 : index
    %186 = vector.load %arg27[%c0_95, %c0_96] : memref<1x32xf32, #tpu.memory_space<vmem>>, vector<1x32xf32>
    %cst_97 = arith.constant dense<0.000000e+00> : vector<8xf32>
    %187 = vector.multi_reduction <add>, %184, %cst_97 [1] : vector<8x32xf32> to vector<8xf32>
    %188 = vector.shape_cast %187 : vector<8xf32> to vector<8x1xf32>
    %cst_98 = arith.constant 3.200000e+01 : f32
    %189 = vector.broadcast %cst_98 : f32 to vector<8x1xf32>
    %190 = arith.divf %188, %189 : vector<8x1xf32>
    %191 = vector.broadcast %190 : vector<8x1xf32> to vector<8x32xf32>
    %192 = arith.subf %184, %191 : vector<8x32xf32>
    %193 = vector.broadcast %190 : vector<8x1xf32> to vector<8x32xf32>
    %194 = arith.subf %184, %193 : vector<8x32xf32>
    %195 = arith.mulf %192, %194 : vector<8x32xf32>
    %cst_99 = arith.constant dense<0.000000e+00> : vector<8xf32>
    %196 = vector.multi_reduction <add>, %195, %cst_99 [1] : vector<8x32xf32> to vector<8xf32>
    %197 = vector.shape_cast %196 : vector<8xf32> to vector<8x1xf32>
    %cst_100 = arith.constant 3.200000e+01 : f32
    %198 = vector.broadcast %cst_100 : f32 to vector<8x1xf32>
    %199 = arith.divf %197, %198 : vector<8x1xf32>
    %200 = vector.broadcast %190 : vector<8x1xf32> to vector<8x32xf32>
    %201 = arith.subf %184, %200 : vector<8x32xf32>
    %cst_101 = arith.constant 9.99999974E-6 : f32
    %202 = vector.broadcast %cst_101 : f32 to vector<8x1xf32>
    %203 = arith.addf %199, %202 : vector<8x1xf32>
    %204 = math.rsqrt %203 : vector<8x1xf32>
    %205 = vector.broadcast %204 : vector<8x1xf32> to vector<8x32xf32>
    %206 = arith.mulf %201, %205 : vector<8x32xf32>
    %207 = vector.broadcast %185 : vector<1x32xf32> to vector<8x32xf32>
    %208 = arith.mulf %206, %207 : vector<8x32xf32>
    %209 = vector.broadcast %186 : vector<1x32xf32> to vector<8x32xf32>
    %210 = arith.addf %208, %209 : vector<8x32xf32>
    %c0_102 = arith.constant 0 : index
    %c0_103 = arith.constant 0 : index
    %c0_104 = arith.constant 0 : index
    %211 = vector.load %arg28[%c0_102, %c0_103, %c0_104] : memref<1x8x32xf32, #tpu.memory_space<vmem>>, vector<1x8x32xf32>
    %212 = vector.shape_cast %211 : vector<1x8x32xf32> to vector<8x32xf32>
    %213 = vector.shape_cast %210 : vector<8x32xf32> to vector<1x8x32xf32>
    tpu.vector_store %arg28[%c0_102, %c0_103, %c0_104], %213 {strides = array<i32>} : memref<1x8x32xf32, #tpu.memory_space<vmem>>, vector<1x8x32xf32>,
    return
  }
  func.func @transform_0(%arg0: i32) -> (i32, i32, i32) {
    %c0_i32 = arith.constant 0 : i32
    %c0_i32_0 = arith.constant 0 : i32
    %c0_i32_1 = arith.constant 0 : i32
    return %arg0, %c0_i32, %c0_i32_0 : i32, i32, i32
  }
  func.func @transform_1(%arg0: i32) -> (i32, i32) {
    %c0_i32 = arith.constant 0 : i32
    %c0_i32_0 = arith.constant 0 : i32
    %c0_i32_1 = arith.constant 0 : i32
    return %c0_i32, %c0_i32_0 : i32, i32
  }
  func.func @transform_2(%arg0: i32) -> (i32, i32) {
    %c0_i32 = arith.constant 0 : i32
    %c0_i32_0 = arith.constant 0 : i32
    %c0_i32_1 = arith.constant 0 : i32
    return %c0_i32, %c0_i32_0 : i32, i32
  }
  func.func @transform_3(%arg0: i32) -> (i32, i32, i32) {
    %c0_i32 = arith.constant 0 : i32
    %c0_i32_0 = arith.constant 0 : i32
    %c0_i32_1 = arith.constant 0 : i32
    %c0_i32_2 = arith.constant 0 : i32
    return %c0_i32, %c0_i32_0, %c0_i32_1 : i32, i32, i32
  }
  func.func @transform_4(%arg0: i32) -> (i32, i32, i32) {
    %c0_i32 = arith.constant 0 : i32
    %c0_i32_0 = arith.constant 0 : i32
    %c0_i32_1 = arith.constant 0 : i32
    %c0_i32_2 = arith.constant 0 : i32
    return %c0_i32, %c0_i32_0, %c0_i32_1 : i32, i32, i32
  }
  func.func @transform_5(%arg0: i32) -> (i32, i32, i32) {
    %c0_i32 = arith.constant 0 : i32
    %c0_i32_0 = arith.constant 0 : i32
    %c0_i32_1 = arith.constant 0 : i32
    %c0_i32_2 = arith.constant 0 : i32
    return %c0_i32, %c0_i32_0, %c0_i32_1 : i32, i32, i32
  }
  func.func @transform_6(%arg0: i32) -> (i32, i32) {
    %c0_i32 = arith.constant 0 : i32
    %c0_i32_0 = arith.constant 0 : i32
    %c0_i32_1 = arith.constant 0 : i32
    return %c0_i32, %c0_i32_0 : i32, i32
  }
  func.func @transform_7(%arg0: i32) -> (i32, i32) {
    %c0_i32 = arith.constant 0 : i32
    %c0_i32_0 = arith.constant 0 : i32
    %c0_i32_1 = arith.constant 0 : i32
    return %c0_i32, %c0_i32_0 : i32, i32
  }
  func.func @transform_8(%arg0: i32) -> (i32, i32) {
    %c0_i32 = arith.constant 0 : i32
    %c0_i32_0 = arith.constant 0 : i32
    %c0_i32_1 = arith.constant 0 : i32
    return %c0_i32, %c0_i32_0 : i32, i32
  }
  func.func @transform_9(%arg0: i32) -> (i32, i32) {
    %c0_i32 = arith.constant 0 : i32
    %c0_i32_0 = arith.constant 0 : i32
    %c0_i32_1 = arith.constant 0 : i32
    return %c0_i32, %c0_i32_0 : i32, i32
  }
  func.func @transform_10(%arg0: i32) -> (i32, i32) {
    %c0_i32 = arith.constant 0 : i32
    %c0_i32_0 = arith.constant 0 : i32
    %c0_i32_1 = arith.constant 0 : i32
    return %c0_i32, %c0_i32_0 : i32, i32
  }
  func.func @transform_11(%arg0: i32) -> (i32, i32) {
    %c0_i32 = arith.constant 0 : i32
    %c0_i32_0 = arith.constant 0 : i32
    %c0_i32_1 = arith.constant 0 : i32
    return %c0_i32, %c0_i32_0 : i32, i32
  }
  func.func @transform_12(%arg0: i32) -> (i32, i32) {
    %c0_i32 = arith.constant 0 : i32
    %c0_i32_0 = arith.constant 0 : i32
    %c0_i32_1 = arith.constant 0 : i32
    return %c0_i32, %c0_i32_0 : i32, i32
  }
  func.func @transform_13(%arg0: i32) -> (i32, i32) {
    %c0_i32 = arith.constant 0 : i32
    %c0_i32_0 = arith.constant 0 : i32
    %c0_i32_1 = arith.constant 0 : i32
    return %c0_i32, %c0_i32_0 : i32, i32
  }
  func.func @transform_14(%arg0: i32) -> (i32, i32) {
    %c0_i32 = arith.constant 0 : i32
    %c0_i32_0 = arith.constant 0 : i32
    %c0_i32_1 = arith.constant 0 : i32
    return %c0_i32, %c0_i32_0 : i32, i32
  }
  func.func @transform_15(%arg0: i32) -> (i32, i32, i32) {
    %c0_i32 = arith.constant 0 : i32
    %c0_i32_0 = arith.constant 0 : i32
    %c0_i32_1 = arith.constant 0 : i32
    %c0_i32_2 = arith.constant 0 : i32
    return %c0_i32, %c0_i32_0, %c0_i32_1 : i32, i32, i32
  }
  func.func @transform_16(%arg0: i32) -> (i32, i32, i32) {
    %c0_i32 = arith.constant 0 : i32
    %c0_i32_0 = arith.constant 0 : i32
    %c0_i32_1 = arith.constant 0 : i32
    %c0_i32_2 = arith.constant 0 : i32
    return %c0_i32, %c0_i32_0, %c0_i32_1 : i32, i32, i32
  }
  func.func @transform_17(%arg0: i32) -> (i32, i32, i32) {
    %c0_i32 = arith.constant 0 : i32
    %c0_i32_0 = arith.constant 0 : i32
    %c0_i32_1 = arith.constant 0 : i32
    %c0_i32_2 = arith.constant 0 : i32
    return %c0_i32, %c0_i32_0, %c0_i32_1 : i32, i32, i32
  }
  func.func @transform_18(%arg0: i32) -> (i32, i32) {
    %c0_i32 = arith.constant 0 : i32
    %c0_i32_0 = arith.constant 0 : i32
    %c0_i32_1 = arith.constant 0 : i32
    return %c0_i32, %c0_i32_0 : i32, i32
  }
  func.func @transform_19(%arg0: i32) -> (i32, i32) {
    %c0_i32 = arith.constant 0 : i32
    %c0_i32_0 = arith.constant 0 : i32
    %c0_i32_1 = arith.constant 0 : i32
    return %c0_i32, %c0_i32_0 : i32, i32
  }
  func.func @transform_20(%arg0: i32) -> (i32, i32) {
    %c0_i32 = arith.constant 0 : i32
    %c0_i32_0 = arith.constant 0 : i32
    %c0_i32_1 = arith.constant 0 : i32
    return %c0_i32, %c0_i32_0 : i32, i32
  }
  func.func @transform_21(%arg0: i32) -> (i32, i32) {
    %c0_i32 = arith.constant 0 : i32
    %c0_i32_0 = arith.constant 0 : i32
    %c0_i32_1 = arith.constant 0 : i32
    return %c0_i32, %c0_i32_0 : i32, i32
  }
  func.func @transform_22(%arg0: i32) -> (i32, i32) {
    %c0_i32 = arith.constant 0 : i32
    %c0_i32_0 = arith.constant 0 : i32
    %c0_i32_1 = arith.constant 0 : i32
    return %c0_i32, %c0_i32_0 : i32, i32
  }
  func.func @transform_23(%arg0: i32) -> (i32, i32) {
    %c0_i32 = arith.constant 0 : i32
    %c0_i32_0 = arith.constant 0 : i32
    %c0_i32_1 = arith.constant 0 : i32
    return %c0_i32, %c0_i32_0 : i32, i32
  }
  func.func @transform_24(%arg0: i32) -> (i32, i32) {
    %c0_i32 = arith.constant 0 : i32
    %c0_i32_0 = arith.constant 0 : i32
    %c0_i32_1 = arith.constant 0 : i32
    return %c0_i32, %c0_i32_0 : i32, i32
  }
  func.func @transform_25(%arg0: i32) -> (i32, i32) {
    %c0_i32 = arith.constant 0 : i32
    %c0_i32_0 = arith.constant 0 : i32
    %c0_i32_1 = arith.constant 0 : i32
    return %c0_i32, %c0_i32_0 : i32, i32
  }
  func.func @transform_26(%arg0: i32) -> (i32, i32) {
    %c0_i32 = arith.constant 0 : i32
    %c0_i32_0 = arith.constant 0 : i32
    %c0_i32_1 = arith.constant 0 : i32
    return %c0_i32, %c0_i32_0 : i32, i32
  }
  func.func @transform_27(%arg0: i32) -> (i32, i32, i32) {
    %c0_i32 = arith.constant 0 : i32
    %c0_i32_0 = arith.constant 0 : i32
    %c0_i32_1 = arith.constant 0 : i32
    return %arg0, %c0_i32, %c0_i32_0 : i32, i32, i32
  }
}

</mosaic_0001>

<bundles_post_ra>
// kernel: tpu_custom_call.1
= control target key start
LH: loop header
LB: loop body
LE: loop exit
PB: predicated region body
PF: predicated region fallthrough
CT: control target
= control target key end

     0   :  { %s5375_s0 = inlined_call_operand.vmem [shape: f32[2,8,32], index: 0, kind: input, shape index: {}]   ;;  %s5376_s1 = inlined_call_operand.vmem [shape: f32[8,32], index: 1, kind: input, shape index: {}]   ;;  %s5377_s2 = inlined_call_operand.vmem [shape: f32[8,8], index: 2, kind: input, shape index: {}]   ;;  %s5378_s3 = inlined_call_operand.vmem [shape: f32[4,32,24], index: 3, kind: input, shape index: {}]   ;;  %s5379_s4 = inlined_call_operand.vmem [shape: f32[4,1,24], index: 4, kind: input, shape index: {}]   ;;  %s5380_s5 = inlined_call_operand.vmem [shape: f32[4,8,32], index: 5, kind: input, shape index: {}]   ;;  %s5381_s6 = inlined_call_operand.vmem [shape: f32[1,32], index: 6, kind: input, shape index: {}]   ;;  %s5382_s7 = inlined_call_operand.vmem [shape: f32[32,64], index: 7, kind: input, shape index: {}]   ;;  %s5383_s8 = inlined_call_operand.vmem [shape: f32[1,64], index: 8, kind: input, shape index: {}]   ;;  %s5384_s9 = inlined_call_operand.vmem [shape: f32[64,32], index: 9, kind: input, shape index: {}]   ;;  %s5385_s10 = inlined_call_operand.vmem [shape: f32[1,32], index: 10, kind: input, shape index: {}]   ;;  %s5386_s11 = inlined_call_operand.vmem [shape: f32[1,32], index: 11, kind: input, shape index: {}]   ;;  %s5387_s12 = inlined_call_operand.vmem [shape: f32[1,32], index: 12, kind: input, shape index: {}]   ;;  %s5388_s13 = inlined_call_operand.vmem [shape: f32[1,32], index: 13, kind: input, shape index: {}]   ;;  %s5389_s14 = inlined_call_operand.vmem [shape: f32[1,32], index: 14, kind: input, shape index: {}]   ;;  %s5390_s15 = inlined_call_operand.vmem [shape: f32[4,32,24], index: 15, kind: input, shape index: {}]   ;;  %s5391_s16 = inlined_call_operand.vmem [shape: f32[4,1,24], index: 16, kind: input, shape index: {}]   ;;  %s5392_s17 = inlined_call_operand.vmem [shape: f32[4,8,32], index: 17, kind: input, shape index: {}]   ;;  %s5393_s18 = inlined_call_operand.vmem [shape: f32[1,32], index: 18, kind: input, shape index: {}]   ;;  %s5394_s19 = inlined_call_operand.vmem [shape: f32[32,64], index: 19, kind: input, shape index: {}]   ;;  %s5395_s20 = inlined_call_operand.vmem [shape: f32[1,64], index: 20, kind: input, shape index: {}]   ;;  %s5396_s21 = inlined_call_operand.vmem [shape: f32[64,32], index: 21, kind: input, shape index: {}]   ;;  %s5397_s22 = inlined_call_operand.vmem [shape: f32[1,32], index: 22, kind: input, shape index: {}]   ;;  %s5398_s23 = inlined_call_operand.vmem [shape: f32[1,32], index: 23, kind: input, shape index: {}]   ;;  %s5399_s24 = inlined_call_operand.vmem [shape: f32[1,32], index: 24, kind: input, shape index: {}]   ;;  %s5400_s25 = inlined_call_operand.vmem [shape: f32[1,32], index: 25, kind: input, shape index: {}]   ;;  %s5401_s26 = inlined_call_operand.vmem [shape: f32[1,32], index: 26, kind: input, shape index: {}]   ;;  %s5402_s27 = inlined_call_operand.hbm [shape: f32[2,8,32], index: 27, kind: output, shape index: {}]  }
   0x1   :  { %5422 = sst [smem:[#allocation11_spill]] %s5375_s0 }
   0x2   :  { %5423 = sst [smem:[#allocation12_spill]] %s5376_s1 }
   0x3   :  { %5424 = sst [smem:[#allocation13_spill]] %s5377_s2 }
   0x4   :  { %5425 = sst [smem:[#allocation14_spill]] %s5378_s3 }
   0x5   :  { %5426 = sst [smem:[#allocation15_spill]] %s5379_s4 }
   0x6   :  { %5427 = sst [smem:[#allocation16_spill]] %s5380_s5 }
   0x7   :  { %5428 = sst [smem:[#allocation17_spill]] %s5381_s6 }
   0x8   :  { %5429 = sst [smem:[#allocation18_spill]] %s5382_s7 }
   0x9   :  { %5430 = sst [smem:[#allocation19_spill]] %s5383_s8 }
   0xa   :  { %5431 = sst [smem:[#allocation20_spill]] %s5384_s9 }
   0xb   :  { %5432 = sst [smem:[#allocation21_spill]] %s5385_s10 }
   0xc   :  { %5433 = sst [smem:[#allocation22_spill]] %s5386_s11 }
   0xd   :  { %5434 = sst [smem:[#allocation23_spill]] %s5387_s12 }
   0xe   :  { %5435 = sst [smem:[#allocation24_spill]] %s5388_s13 }
   0xf   :  { %5436 = sst [smem:[#allocation25_spill]] %s5389_s14 }
  0x10   :  { %5437 = sst [smem:[#allocation26_spill]] %s5402_s27 }
  0x11   :  { %32 = vsyncpa [#allocation3], 0 }
  0x12   :  { %34 = vsyncpa [#allocation3 + $0x1], 0  ;;  %s4725_s7 = smov 0   ;;  %s4727_s4 = smov 0  }
  0x13   :  { %s4729_s8 = smov 0   ;;  %s4731_s30 = smov 0  }
  0x14 LB: > { %5438 = sst [smem:[#allocation5_spill]] %s4566_s7  ;;  %s4746_s9 = sadd.s32 4294967295, %s4578_s30   ;;  %s4578_s30 = sphi %s4731_s30, %s5469_s30   ;;  %s4574_s8 = sphi %s4729_s8, %s5471_s8   ;;  %s4570_s4 = sphi %s4727_s4, %s5473_s4   ;;  %s4566_s7 = sphi %s4725_s7, %s5472_s7  }
  0x15   : > { %5439 = sst [smem:[#allocation6_spill]] %s4574_s8  ;;  %s3975_s5 = sadd.s32 4294967294, %s4578_s30  }
  0x16   : > { %5440 = sst [smem:[#allocation7_spill]] %s4578_s30  ;;  %s4750_s28 = sadd.s32 1, %s4578_s30  }
  0x17   : > { %5441 = sst [smem:[#allocation8_spill]] %s4750_s28  ;;  %s619_s0 = sadd.s32 1, %s4574_s8 }
  0x18   : > { %s616_s10 = ssub.s32 %s4578_s30, %s4750_s28  ;;  %p629_p0 = scmp.ne.s32.totalorder %s4574_s8, %s4570_s4 }
  0x19   : > { %p617_p1 = scmp.eq.s32.totalorder %s616_s10, 0  ;;  %p630_p2 = scmp.eq.s32.totalorder %s4746_s9, 1 }
  0x1a   : > { %p635_p3 = scmp.ne.s32.totalorder %s4570_s4, %s4566_s7  ;;  %p636_p4 = scmp.eq.s32.totalorder %s3975_s5, 1 }
  0x1b   : > { %s4761_s29 = scalar_select %p617_p1, %s4574_s8, %s619_s0  }
  0x1c   : > { %p4763_p5 = por %p630_p2, %p629_p0  ;;  %p4767_p6 = por %p636_p4, %p635_p3 }
  0x1d   : > { %5442 = sst [smem:[#allocation9_spill]] %s4761_s29  ;;  %p3978_p7 = scmp.ge.s32.totalorder %s4578_s30, 1 }
  0x1e   : > { %s5444_s6 = scalar_select %p4767_p6, 1, 0 }
  0x1f   : > { %p739_p8 = scmp.lt.s32.totalorder %s4578_s30, 3 }
  0x20   : > { %5445 = sst [smem:[#allocation10_spill]] %s5444_s6 }
  0x21   : > { %p740_p9 = pnand %p3978_p7, %p739_p8 }
  0x22   : > { %s5446_s3 = sld [smem:[#allocation14_spill]] (!%p740_p9)  ;;  %p810_p10 = scmp.lt.s32.totalorder (!%p740_p9), %s4746_s9, 1 }
  0x23   : > { %743 = sbr.rel (%p740_p9) target bundleno = 4593 (0x11f1), region = 128  ;;  %s5447_s2 = sld [smem:[#allocation11_spill]] (!%p740_p9) }
  0x24   : > { %s5448_s0 = sld [smem:[#allocation12_spill]] (!%p740_p9)  ;;  %s5415_s28 = smov (!%p740_p9), 112  }
  0x25   : > { %s5449_s6 = sld [smem:[#allocation15_spill]] (!%p740_p9) }
  0x26   : > { %s5450_s30 = sld [smem:[#allocation13_spill]] (!%p740_p9) }
  0x27   : > { %s5451_s29 = sld [smem:[#allocation16_spill]] (!%p740_p9) }
  0x28   : > { %v822_v0 = vld [vmem:[%s5446_s3 + $0x18] sm:$0xff]  ;;  %v4580_v1 = vmov 0.0   ;;  %v821_v2 = vld [vmem:[%s5446_s3 + $0x10] sm:$0xff]  ;;  %s811_s11 = scalar_select %p810_p10, %s4746_s9, 1  ;;  %v820_v5 = vld [vmem:[%s5446_s3 + $0x8] sm:$0xff]  ;;  %vm4581_vm0 = vmmov 0  }
  0x29   : > { %4167 = vmatprep.subr.mxu0 %v4580_v1  ;;  %4178 = vmatprep.subr.mxu1 %v4580_v1  ;;  %v826_v3 = vld [vmem:[%s5446_s3 + $0x38] sm:$0xff]  ;;  %v825_v4 = vld [vmem:[%s5446_s3 + $0x30] sm:$0xff]  ;;  %v824_v6 = vld [vmem:[%s5446_s3 + $0x28] sm:$0xff]  ;;  %vm863_vm1 = vcmask 261120   ;;  %vm1150_vm2 = vcmask 64512   ;;  %s5453_s8 = sld [smem:[#allocation18_spill]] }
  0x2a   : > { %4168 = vmatpush3.msra.mxu0 %v822_v0  ;;  %4179 = vmatpush3.msra.mxu1 %v826_v3  ;;  %s3980_s5 = sshll.u32 %s811_s11, 3  ;;  %v819_v7 = vld [vmem:[%s5446_s3] sm:$0xff]  ;;  %v830_v13 = vld [vmem:[%s5446_s3 + $0x58] sm:$0xff]  ;;  %v829_v15 = vld [vmem:[%s5446_s3 + $0x50] sm:$0xff]  ;;  %s5417_s11 = smov 120   ;;  %vm2258_vm3 = vcmask 523264  }
  0x2b   : > { %4169 = vmatprep.subr.mxu0 %v4580_v1  ;;  %4180 = vmatprep.subr.mxu1 %v4580_v1  ;;  %s813_s7 = scalar_lea.vmem %s5447_s2, %s3980_s5  ;;  %v816_v9 = vld [vmem:[%s5448_s0] sm:$0xff]  ;;  %v834_v14 = vld [vmem:[%s5446_s3 + $0x78] sm:$0xff]  ;;  %v833_v16 = vld [vmem:[%s5446_s3 + $0x70] sm:$0xff]  ;;  %s5452_s0 = sld [smem:[#allocation17_spill]] }
  0x2c   : > { %4170 = vmatpush3.msra.mxu0 %v821_v2  ;;  %4181 = vmatpush3.msra.mxu1 %v825_v4  ;;  %v814_v8 = vld [vmem:[%s813_s7] sm:$0xff]  ;;  %v828_v17 = vld [vmem:[%s5446_s3 + $0x48] sm:$0xff]  ;;  %s5458_s12 = sld [smem:[#allocation23_spill]]  ;;  %s5463_s7 = smov 120  }
  0x2d   : > { %4171 = vmatprep.subr.mxu0 %v4580_v1  ;;  %4175 = vmatprep.mubr.msk.f32.mxu0 %vm4581_vm0, %v4580_v1  ;;  %v823_v10 = vld [vmem:[%s5446_s3 + $0x20] sm:$0xff]  ;;  %v815_v11 = vmul.f32 5.656854, %v814_v8  ;;  %v832_v18 = vld [vmem:[%s5446_s3 + $0x68] sm:$0xff]  ;;  %s5461_s13 = sld [smem:[#allocation24_spill]]  ;;  %s4048_s2 = sshll.u32 %s4746_s9, 7 }
  0x2e   : > { %4172 = vmatpush3.msra.mxu0 %v820_v5  ;;  %4182 = vmatprep.subr.mxu1 %v4580_v1  ;;  %v827_v19 = vld [vmem:[%s5446_s3 + $0x40] sm:$0xff]  ;;  %s5462_s14 = sld [smem:[#allocation25_spill]]  ;;  %s4584_s5 = smov [#allocation2]  }
  0x2f   : > { %4173 = vmatprep.subr.mxu0 %v4580_v1  ;;  %4183 = vmatpush3.msra.mxu1 %v824_v6  ;;  %v4816_v12 = vadd.f32 %v816_v9, %v815_v11  ;;  %v831_v20 = vld [vmem:[%s5446_s3 + $0x60] sm:$0xff]  ;;  %s5454_s27 = smov %s5453_s8  ;;  %s5460_s3 = sld [smem:[#allocation21_spill]] }
  0x30   : > { %4174 = vmatpush3.msra.mxu0 %v819_v7  ;;  %4184 = vmatprep.subr.mxu1 %v4580_v1  ;;  %v3981_v21 = vld [vmem:[%s5449_s6] ss:$0 sm:$0xff]  ;;  %v3982_v23 = vld [vmem:[%s5449_s6 + $0x1] ss:$0 sm:$0xff]  ;;  %v3983_v29 = vld [vmem:[%s5449_s6 + $0x2] ss:$0 sm:$0xff] }
  0x31   : > { %4189 = vmatprep.subr.mxu0 %v4580_v1  ;;  %4185 = vmatpush3.msra.mxu1 %v823_v10  ;;  %v3984_v31 = vld [vmem:[%s5449_s6 + $0x3] ss:$0 sm:$0xff]  ;;  %s5464_s6 = smov 112  }
  0x32   : > { %4186 = vmatprep.mubr.msk.f32.mxu1 %vm4581_vm0, %v4580_v1  ;;  %4200 = vmatprep.subr.mxu1 %v4580_v1  ;;  %v4920_v41 = vld [vmem:[%s5450_s30] sm:$0xff]  ;;  %s5457_s30 = sld [smem:[#allocation22_spill]] }
  0x33   : > { %4176 = vmatmul.mubr.msk.f32.vlgmr.msra.gmra.mxu0 %vm863_vm1, %v4816_v12  ;;  %4187 = vmatmul.mubr.msk.f32.vlgmr.msra.gmra.mxu1 %vm863_vm1, %v4816_v12 }
  0x34   : > { %4190 = vmatpush3.msra.mxu0 %v830_v13  ;;  %4201 = vmatpush3.msra.mxu1 %v834_v14 }
  0x35   : > { %4191 = vmatprep.subr.mxu0 %v4580_v1  ;;  %4202 = vmatprep.subr.mxu1 %v4580_v1 }
  0x36   : > { %4192 = vmatpush3.msra.mxu0 %v829_v15  ;;  %4197 = vmatprep.mubr.msk.f32.mxu0 %vm4581_vm0, %v4580_v1 }
  0x37   : > { %4193 = vmatprep.subr.mxu0 %v4580_v1  ;;  %4203 = vmatpush3.msra.mxu1 %v833_v16 }
  0x38   : > { %4194 = vmatpush3.msra.mxu0 %v828_v17  ;;  %4204 = vmatprep.subr.mxu1 %v4580_v1 }
  0x39   : > { %4195 = vmatprep.subr.mxu0 %v4580_v1  ;;  %4205 = vmatpush3.msra.mxu1 %v832_v18 }
  0x3a   : > { %4196 = vmatpush3.msra.mxu0 %v827_v19  ;;  %4206 = vmatprep.subr.mxu1 %v4580_v1 }
  0x3b   : > { %4198 = vmatmul.mubr.msk.f32.vlgmr.msra.gmra.mxu0 %vm863_vm1, %v4816_v12  ;;  %4207 = vmatpush3.msra.mxu1 %v831_v20 }
  0x3c   : > { %4208 = vmatprep.mubr.msk.f32.mxu1 %vm4581_vm0, %v4580_v1  ;;  %4211 = vmatprep.subr.mxu0 %v4580_v1 }
  0x3d   : > { %4209 = vmatmul.mubr.msk.f32.vlgmr.msra.gmra.mxu1 %vm863_vm1, %v4816_v12  ;;  %4213 = vmatprep.mubr.msk.f32.mxu0 %vm4581_vm0, %v4580_v1 }
  0x3e   : > { %4226 = vmatprep.subr.mxu1 %v4580_v1  ;;  %4228 = vmatprep.mubr.msk.f32.mxu1 %vm4581_vm0, %v4580_v1 }
  0xf3   : > { %v933_v22 = vpop.f32.mrf.mxu0  ;;  %v1003_v24 = vpop.f32.mrf.mxu1 }
  0xf4   : > { %v934_v25 = vadd.f32 %v3981_v21, %v933_v22  ;;  %v4876_v28 = vadd.f32 %v3982_v23, %v1003_v24 }
  0xf5   : > { %v4177_v26 = vpop.f32.mrf.mxu0  ;;  %v4188_v27 = vpop.f32.mrf.mxu1 }
  0xf6   : > { %1148 = vrot.lane.b32.xlu0 %v934_v25, %s5417_s11 }
  0xfa   : > { %1226 = vrot.lane.b32.xlu0 %v4876_v28, %s5417_s11 }
  0xfb   : > { %v1073_v30 = vpop.f32.mrf.mxu0 }
  0xfc   : > { %v4886_v32 = vadd.f32 %v3983_v29, %v1073_v30 }
  0xfd   : > { %v1143_v33 = vpop.f32.mrf.mxu1  ;;  %v4199_v34 = vpop.f32.mrf.mxu0 }
  0xfe   : > { %1303 = vrot.lane.b32.xlu1 %v4886_v32, %s5417_s11  ;;  %v4890_v35 = vadd.f32 %v3984_v31, %v1143_v33 }
  0xff   : > { %v4210_v36 = vpop.f32.mrf.mxu1 }
 0x102   : > { %1380 = vrot.lane.b32.xlu1 %v4890_v35, %s5417_s11  ;;  %s5459_s11 = sld [smem:[#allocation19_spill]] }
 0x168   : > { %v1149_v37 = vpop.permute.xlu0 %1148 }
 0x169   : > { %4212 = vmatpush3.xpose.msk.msra.mxu0 %vm1150_vm2, %v1149_v37 }
 0x16a   : > { %4216 = vmatprep.subr.mxu0 %v4580_v1 }
 0x16c   : > { %4214 = vmatmul.mubr.msk.f32.vlgmr.msra.gmra.mxu0 %vm1150_vm2, %v934_v25  ;;  %v1227_v38 = vpop.permute.xlu0 %1226 }
 0x16d   : > { %4217 = vmatpush3.xpose.msk.msra.mxu0 %vm1150_vm2, %v1227_v38  ;;  %4218 = vmatprep.mubr.msk.f32.mxu0 %vm4581_vm0, %v4580_v1 }
 0x16e   : > { %4221 = vmatprep.subr.mxu0 %v4580_v1 }
 0x170   : > { %v1304_v39 = vpop.permute.xlu1 %1303  ;;  %4219 = vmatmul.mubr.msk.f32.vlgmr.msra.gmra.mxu0 %vm1150_vm2, %v4876_v28 }
 0x171   : > { %4222 = vmatpush3.xpose.msk.msra.mxu0 %vm1150_vm2, %v1304_v39  ;;  %4223 = vmatprep.mubr.msk.f32.mxu0 %vm4581_vm0, %v4580_v1 }
 0x172   : > { %4231 = vmatprep.subr.mxu0 %v4580_v1 }
 0x174   : > { %v1381_v40 = vpop.permute.xlu1 %1380  ;;  %4224 = vmatmul.mubr.msk.f32.vlgmr.msra.gmra.mxu0 %vm1150_vm2, %v4886_v32 }
 0x175   : > { %4227 = vmatpush3.xpose.msk.msra.mxu1 %vm1150_vm2, %v1381_v40  ;;  %4233 = vmatprep.mubr.msk.f32.mxu0 %vm4581_vm0, %v4580_v1 }
 0x176   : > { %4236 = vmatprep.subr.mxu1 %v4580_v1 }
 0x178   : > { %4229 = vmatmul.mubr.msk.f32.vlgmr.msra.gmra.mxu1 %vm1150_vm2, %v4890_v35 }
 0x179   : > { %4238 = vmatprep.mubr.msk.f32.mxu1 %vm4581_vm0, %v4580_v1 }
 0x22c   : > { %v1221_v42 = vpop.f32.mrf.mxu0 }
 0x22d   : > { %v1222_v43 = vadd.f32 %v1221_v42, %v4920_v41 }
 0x22e   : > { %v4215_v44 = vpop.f32.mrf.mxu0 }
 0x22f   : > { %v1456_v45 = vsel %vm1150_vm2, %v1222_v43, -inf }
 0x230   : > { %1457 = vmax.xlane.f32.xlu0 %v1456_v45  ;;  %v1298_v46 = vpop.f32.mrf.mxu0  ;;  %v1816_v45 = vld [vmem:[%s5451_s29] sm:$0xff] }
 0x231   : > { %v1299_v47 = vadd.f32 %v1298_v46, %v4920_v41  ;;  %v1817_v46 = vld [vmem:[%s5451_s29 + $0x8] sm:$0xff] }
 0x232   : > { %v4220_v48 = vpop.f32.mrf.mxu0 }
 0x233   : > { %v1459_v49 = vsel %vm1150_vm2, %v1299_v47, -inf }
 0x234   : > { %1460 = vmax.xlane.f32.xlu1 %v1459_v49  ;;  %v1375_v50 = vpop.f32.mrf.mxu0 }
 0x235   : > { %v1376_v51 = vadd.f32 %v1375_v50, %v4920_v41  ;;  %v1819_v50 = vld [vmem:[%s5451_s29 + $0x18] sm:$0xff] }
 0x236   : > { %v4225_v52 = vpop.f32.mrf.mxu0 }
 0x237   : > { %v1462_v53 = vsel %vm1150_vm2, %v1376_v51, -inf }
 0x238   : > { %v1452_v54 = vpop.f32.mrf.mxu1  ;;  %1463 = vmax.xlane.f32.xlu0 %v1462_v53 }
 0x239   : > { %v1453_v55 = vadd.f32 %v1452_v54, %v4920_v41 }
 0x23a   : > { %v4230_v56 = vpop.f32.mrf.mxu1 }
 0x23b   : > { %v1465_v57 = vsel %vm1150_vm2, %v1453_v55, -inf }
 0x23c   : > { %1466 = vmax.xlane.f32.xlu0 %v1465_v57 }
 0x245   : > { %1512 = vrot.lane.b32.xlu1 %v934_v25, %s5415_s28 }
 0x2b9   : > { %v1458_v58 = vpop.xlane.xlu0 %1457 }
 0x2ba   : > { %v1468_v59 = vsub.f32 %v1222_v43, %v1458_v58 }
 0x2bc   : > { %v1472_v60 = vmul.f32 1.442695, %v1468_v59 }
 0x2bd   : > { %v1461_v61 = vpop.xlane.xlu1 %1460 }
 0x2be   : > { %4478 = vpow2.f32 %v1472_v60  ;;  %v1469_v62 = vsub.f32 %v1299_v47, %v1461_v61  ;;  %v1818_v47 = vld [vmem:[%s5451_s29 + $0x10] sm:$0xff] }
 0x2c0   : > { %v1474_v63 = vmul.f32 1.442695, %v1469_v62 }
 0x2c1   : > { %v1513_v0 = vpop.permute.xlu1 %1512  ;;  %v1464_v2 = vpop.xlane.xlu0 %1463 }
 0x2c2   : > { %4480 = vpow2.f32 %v1474_v63  ;;  %4232 = vmatpush3.msra.mxu0 %v1513_v0  ;;  %v1470_v13 = vsub.f32 %v1376_v51, %v1464_v2 }
 0x2c3   : > { %4241 = vmatprep.subr.mxu0 %v4580_v1 }
 0x2c4   : > { %v1476_v14 = vmul.f32 1.442695, %v1470_v13 }
 0x2c5   : > { %v1467_v3 = vpop.xlane.xlu0 %1466 }
 0x2c6   : > { %v1471_v4 = vsub.f32 %v1453_v55, %v1467_v3 }
 0x2c8   : > { %v1478_v5 = vmul.f32 1.442695, %v1471_v4 }
 0x2ca   : > { %4482 = vpow2.f32 %v1478_v5 }
 0x2cb   : > { %v4479_v6 = vpop.eup %4478  ;;  %4484 = vpow2.f32 %v1476_v14 }
 0x2cc   : > { %v1480_v7 = vsel %vm1150_vm2, %v4479_v6, 0.0 }
 0x2cd   : > { %1481 = vadd.xlane.f32.xlu1 %v1480_v7 }
 0x2cf   : > { %v4481_v8 = vpop.eup %4480 }
 0x2d0   : > { %v1483_v9 = vsel %vm1150_vm2, %v4481_v8, 0.0 }
 0x2d1   : > { %1484 = vadd.xlane.f32.xlu0 %v1483_v9 }
 0x2d7   : > { %v4483_v10 = vpop.eup %4482 }
 0x2d8   : > { %v1489_v11 = vsel %vm1150_vm2, %v4483_v10, 0.0  ;;  %v4485_v15 = vpop.eup %4484 }
 0x2d9   : > { %1490 = vadd.xlane.f32.xlu0 %v1489_v11  ;;  %v1486_v16 = vsel %vm1150_vm2, %v4485_v15, 0.0 }
 0x2de   : > { %1664 = vrot.lane.b32.xlu1 %v4886_v32, %s5415_s28 }
 0x2ef   : > { %1588 = vrot.lane.b32.xlu0 %v4876_v28, %s5415_s28 }
 0x302   : > { %1487 = vadd.xlane.f32.xlu1 %v1486_v16 }
 0x313   : > { %1740 = vrot.lane.b32.xlu1 %v4890_v35, %s5415_s28 }
 0x356   : > { %v1482_v17 = vpop.xlane.xlu1 %1481 }
 0x357   : > { %4486 = vrcp.f32 %v1482_v17 }
 0x35a   : > { %v1485_v18 = vpop.xlane.xlu0 %1484  ;;  %v1665_v29 = vpop.permute.xlu1 %1664 }
 0x35b   : > { %4488 = vrcp.f32 %v1485_v18 }
 0x362   : > { %v1491_v19 = vpop.xlane.xlu0 %1490 }
 0x363   : > { %4490 = vrcp.f32 %v1491_v19 }
 0x364   : > { %v4487_v20 = vpop.eup %4486 }
 0x365   : > { %v1496_v21 = vmul.f32 %v4487_v20, %v1482_v17 }
 0x366   : > { %v1589_v22 = vpop.permute.xlu0 %1588 }
 0x367   : > { %v1500_v23 = vsub.f32 2.0, %v1496_v21  ;;  %4237 = vmatpush3.msra.mxu1 %v1589_v22  ;;  %v2158_v21 = vld [vmem:[%s5454_s27] sm:$0xff] }
 0x368   : > { %v4489_v24 = vpop.eup %4488  ;;  %4246 = vmatprep.subr.mxu1 %v4580_v1 }
 0x369   : > { %v1504_v25 = vmul.f32 %v4487_v20, %v1500_v23  ;;  %v1497_v26 = vmul.f32 %v4489_v24, %v1485_v18  ;;  %v2160_v20 = vld [vmem:[%s5454_s27 + $0x10] sm:$0xff] }
 0x36b   : > { %v1508_v27 = vmul.f32 %v4479_v6, %v1504_v25  ;;  %v1501_v28 = vsub.f32 2.0, %v1497_v26 }
 0x36d   : > { %v1505_v30 = vmul.f32 %v4489_v24, %v1501_v28  ;;  %4234 = vmatmul.mubr.msk.f32.vlgmr.msra.gmra.mxu0 %vm1150_vm2, %v1508_v27 }
 0x36e   : > { %4242 = vmatpush3.msra.mxu0 %v1665_v29  ;;  %4243 = vmatprep.mubr.msk.f32.mxu0 %vm4581_vm0, %v4580_v1 }
 0x36f   : > { %v1509_v31 = vmul.f32 %v4481_v8, %v1505_v30  ;;  %4251 = vmatprep.subr.mxu0 %v4580_v1  ;;  %v4005_v8 = vld [vmem:[%s5452_s0] ss:$0 sm:$0xff]  ;;  %s807_s0 = sand.u32 1, %s4570_s4  }
 0x370   : > { %v4491_v32 = vpop.eup %4490 }
 0x371   : > { %4239 = vmatmul.mubr.msk.f32.vlgmr.msra.gmra.mxu1 %vm1150_vm2, %v1509_v31  ;;  %v1499_v33 = vmul.f32 %v4491_v32, %v1491_v19  ;;  %v2161_v19 = vld [vmem:[%s5453_s8 + $0x18] sm:$0xff]  ;;  %s5455_s8 = sld [smem:[#allocation20_spill]]  ;;  %v4006_v31 = vld [vmem:[%s5457_s30] ss:$0 sm:$0xff] }
 0x372   : > { %4248 = vmatprep.mubr.msk.f32.mxu1 %vm4581_vm0, %v4580_v1 }
 0x373   : > { %v1503_v34 = vsub.f32 2.0, %v1499_v33  ;;  %v4007_v33 = vld [vmem:[%s5458_s12] ss:$0 sm:$0xff]  ;;  %s5465_s12 = sld [smem:[#allocation26_spill]] }
 0x375   : > { %v1507_v35 = vmul.f32 %v4491_v32, %v1503_v34 }
 0x377   : > { %v1511_v37 = vmul.f32 %v4483_v10, %v1507_v35  ;;  %s5456_s10 = smov %s5455_s8  ;;  %v2250_v22 = vld [vmem:[%s5455_s8 + $0x38] sm:$0xff]  ;;  %s4522_s8 = sshll.u32 %s4584_s5, 4  ;;  %s4523_s8 = int_to_ptr.vmem [resolvable:$false] %s4522_s8 }
 0x378   : > { %v2249_v23 = vld [vmem:[%s5456_s10 + $0x30] sm:$0xff]  ;;  %v2248_v24 = vld [vmem:[%s5456_s10 + $0x28] sm:$0xff]  ;;  %v2247_v25 = vld [vmem:[%s5456_s10 + $0x20] sm:$0xff]  ;;  %s4524_s9 = scalar_lea.vmem %s4523_s8, 256 }
 0x379   : > { %v2246_v26 = vld [vmem:[%s5456_s10 + $0x18] sm:$0xff] }
 0x38b   : > { %v1488_v36 = vpop.xlane.xlu1 %1487 }
 0x38c   : > { %4492 = vrcp.f32 %v1488_v36 }
 0x38f   : > { %v1741_v38 = vpop.permute.xlu1 %1740 }
 0x390   : > { %4247 = vmatpush3.msra.mxu1 %v1741_v38  ;;  %v2243_v38 = vld [vmem:[%s5456_s10] sm:$0xff] }
 0x391   : > { %4249 = vmatmul.mubr.msk.f32.vlgmr.msra.gmra.mxu1 %vm1150_vm2, %v1511_v37  ;;  %4256 = vmatprep.subr.mxu1 %v4580_v1  ;;  %v2244_v37 = vld [vmem:[%s5456_s10 + $0x8] sm:$0xff] }
 0x392   : > { %4258 = vmatprep.mubr.msk.f32.mxu1 %vm4581_vm0, %v4580_v1  ;;  %4257 = vmatpush3.msra.mxu1 %v1817_v46 }
 0x393   : > { %4266 = vmatprep.subr.mxu1 %v4580_v1 }
 0x399   : > { %v4493_v39 = vpop.eup %4492 }
 0x39a   : > { %v1498_v40 = vmul.f32 %v4493_v39, %v1488_v36  ;;  %v2245_v36 = vld [vmem:[%s5456_s10 + $0x10] sm:$0xff] }
 0x39c   : > { %v1502_v42 = vsub.f32 2.0, %v1498_v40 }
 0x39e   : > { %v1506_v43 = vmul.f32 %v4493_v39, %v1502_v42  ;;  %v4008_v39 = vld [vmem:[%s5459_s11] ss:$0 sm:$0xff] }
 0x3a0   : > { %v1510_v44 = vmul.f32 %v4485_v15, %v1506_v43 }
 0x3a2   : > { %4244 = vmatmul.mubr.msk.f32.vlgmr.msra.gmra.mxu0 %vm1150_vm2, %v1510_v44 }
 0x3a3   : > { %4253 = vmatprep.mubr.msk.f32.mxu0 %vm4581_vm0, %v4580_v1  ;;  %4252 = vmatpush3.msra.mxu0 %v1816_v45  ;;  %v4010_v45 = vld [vmem:[%s5460_s3] ss:$0 sm:$0xff]  ;;  %s3979_s3 = sshll.u32 %s807_s0, 3 }
 0x3a4   : > { %4261 = vmatprep.subr.mxu0 %v4580_v1 }
 0x42d   : > { %v1584_v48 = vpop.f32.mrf.mxu0 }
 0x42e   : > { %4254 = vmatmul.mubr.msk.f32.vlgmr.msra.gmra.mxu0 %vm1150_vm2, %v1584_v48 }
 0x42f   : > { %v4235_v49 = vpop.f32.mrf.mxu0  ;;  %4262 = vmatpush3.msra.mxu0 %v1818_v47  ;;  %4263 = vmatprep.mubr.msk.f32.mxu0 %vm4581_vm0, %v4580_v1 }
 0x430   : > { %4271 = vmatprep.subr.mxu0 %v4580_v1 }
 0x431   : > { %v1660_v51 = vpop.f32.mrf.mxu1 }
 0x432   : > { %4259 = vmatmul.mubr.msk.f32.vlgmr.msra.gmra.mxu1 %vm1150_vm2, %v1660_v51 }
 0x433   : > { %v4240_v52 = vpop.f32.mrf.mxu1  ;;  %4267 = vmatpush3.msra.mxu1 %v1819_v50  ;;  %4268 = vmatprep.mubr.msk.f32.mxu1 %vm4581_vm0, %v4580_v1 }
 0x434   : > { %4282 = vmatprep.subr.mxu1 %v4580_v1 }
 0x451   : > { %v1812_v53 = vpop.f32.mrf.mxu1 }
 0x452   : > { %4269 = vmatmul.mubr.msk.f32.vlgmr.msra.gmra.mxu1 %vm1150_vm2, %v1812_v53 }
 0x453   : > { %v4250_v54 = vpop.f32.mrf.mxu1  ;;  %4298 = vmatprep.mubr.msk.f32.mxu1 %vm4581_vm0, %v4580_v1  ;;  %4283 = vmatpush3.msra.mxu1 %v2250_v22  ;;  %v4016_v22 = vld [vmem:[%s5391_s16 + $0x2] ss:$0 sm:$0xff] }
 0x454   : > { %4284 = vmatprep.subr.mxu1 %v4580_v1 }
 0x455   : > { %4285 = vmatpush3.msra.mxu1 %v2249_v23 }
 0x456   : > { %4286 = vmatprep.subr.mxu1 %v4580_v1 }
 0x457   : > { %4287 = vmatpush3.msra.mxu1 %v2248_v24 }
 0x458   : > { %4288 = vmatprep.subr.mxu1 %v4580_v1 }
 0x459   : > { %4289 = vmatpush3.msra.mxu1 %v2247_v25 }
 0x45a   : > { %4290 = vmatprep.subr.mxu1 %v4580_v1 }
 0x45b   : > { %4291 = vmatpush3.msra.mxu1 %v2246_v26  ;;  %v4015_v26 = vld [vmem:[%s5391_s16 + $0x1] ss:$0 sm:$0xff] }
 0x45c   : > { %4292 = vmatprep.subr.mxu1 %v4580_v1 }
 0x45d   : > { %4293 = vmatpush3.msra.mxu1 %v2245_v36 }
 0x45e   : > { %4294 = vmatprep.subr.mxu1 %v4580_v1 }
 0x45f   : > { %4295 = vmatpush3.msra.mxu1 %v2244_v37 }
 0x460   : > { %4296 = vmatprep.subr.mxu1 %v4580_v1 }
 0x461   : > { %4297 = vmatpush3.msra.mxu1 %v2243_v38 }
 0x462   : > { %v1736_v55 = vpop.f32.mrf.mxu0  ;;  %4323 = vmatprep.subr.mxu1 %v4580_v1 }
 0x463   : > { %4264 = vmatmul.mubr.msk.f32.vlgmr.msra.gmra.mxu0 %vm1150_vm2, %v1736_v55 }
 0x464   : > { %v4245_v56 = vpop.f32.mrf.mxu0  ;;  %4279 = vmatprep.mubr.msk.f32.mxu0 %vm4581_vm0, %v4580_v1  ;;  %4272 = vmatpush3.msra.mxu0 %v2161_v19  ;;  %v4014_v19 = vld [vmem:[%s5391_s16] ss:$0 sm:$0xff] }
 0x465   : > { %4273 = vmatprep.subr.mxu0 %v4580_v1  ;;  %v2365_v56 = vld [vmem:[%s5390_s15 + $0x18] sm:$0xff] }
 0x466   : > { %4274 = vmatpush3.msra.mxu0 %v2160_v20 }
 0x467   : > { %4275 = vmatprep.subr.mxu0 %v4580_v1 }
 0x4ee   : > { %v1889_v57 = vpop.f32.mrf.mxu0 }
 0x4ef   : > { %v2112_v0 = vsel %vm863_vm1, %v1889_v57, 0.0  ;;  %v2373_v57 = vld [vmem:[%s5390_s15 + $0x58] sm:$0xff] }
 0x4f0   : > { %v4255_v58 = vpop.f32.mrf.mxu0 }
 0x4f1   : > { %v2364_v58 = vld [vmem:[%s5390_s15 + $0x10] sm:$0xff] }
 0x4f2   : > { %v1962_v59 = vpop.f32.mrf.mxu1 }
 0x4f3   : > { %v2113_v63 = vsel %vm863_vm1, %v1962_v59, 0.0  ;;  %v2372_v59 = vld [vmem:[%s5390_s15 + $0x50] sm:$0xff] }
 0x4f4   : > { %v4260_v60 = vpop.f32.mrf.mxu1  ;;  %v2114_v2 = vadd.f32 %v2113_v63, %v2112_v0  ;;  %v2370_v63 = vld [vmem:[%s5390_s15 + $0x40] sm:$0xff] }
 0x4f5   : > { %v2363_v60 = vld [vmem:[%s5390_s15 + $0x8] sm:$0xff] }
 0x512   : > { %v2108_v61 = vpop.f32.mrf.mxu1 }
 0x513   : > { %v2117_v7 = vsel %vm863_vm1, %v2108_v61, 0.0  ;;  %v2371_v61 = vld [vmem:[%s5390_s15 + $0x48] sm:$0xff] }
 0x514   : > { %v4270_v62 = vpop.f32.mrf.mxu1 }
 0x515   : > { %v2362_v62 = vld [vmem:[%s5390_s15] sm:$0xff] }
 0x523   : > { %v2035_v3 = vpop.f32.mrf.mxu0 }
 0x524   : > { %v2115_v4 = vsel %vm863_vm1, %v2035_v3, 0.0 }
 0x525   : > { %v2116_v5 = vadd.f32 %v2115_v4, %v2114_v2  ;;  %v4265_v6 = vpop.f32.mrf.mxu0 }
 0x527   : > { %v2118_v9 = vadd.f32 %v2117_v7, %v2116_v5  ;;  %v4012_v5 = vld [vmem:[%s5461_s13] ss:$0 sm:$0xff]  ;;  %s3914_s13 = scalar_lea.hbm %s5465_s12, %s4048_s2 }
 0x528   : > { %v4013_v7 = vld [vmem:[%s5462_s14] ss:$0 sm:$0xff]  ;;  %s3903_s14 = scalar_lea.sflag [#allocation3], %s807_s0 }
 0x529   : > { %v2126_v10 = vadd.f32 %v4005_v8, %v2118_v9 }
 0x52b   : > { %v2127_v11 = vadd.f32 %v2126_v10, %v4816_v12  ;;  %v2159_v12 = vld [vmem:[%s5454_s27 + $0x8] sm:$0xff]  ;;  %v2369_v10 = vld [vmem:[%s5390_s15 + $0x38] sm:$0xff] }
 0x52c   : > { %4276 = vmatpush3.msra.mxu0 %v2159_v12 }
 0x52d   : > { %v2130_v13 = vsel %vm863_vm1, %v2127_v11, 0.0  ;;  %4277 = vmatprep.subr.mxu0 %v4580_v1 }
 0x52e   : > { %2131 = vadd.xlane.f32.xlu0 %v2130_v13  ;;  %4278 = vmatpush3.msra.mxu0 %v2158_v21  ;;  %v2367_v13 = vld [vmem:[%s5390_s15 + $0x28] sm:$0xff] }
 0x52f   : > { %4301 = vmatprep.subr.mxu0 %v4580_v1 }
 0x5b7   : > { %v2132_v14 = vpop.xlane.xlu0 %2131 }
 0x5b8   : > { %v2134_v15 = vmul.f32 0.03125, %v2132_v14  ;;  %v2366_v14 = vld [vmem:[%s5390_s15 + $0x20] sm:$0xff] }
 0x5ba   : > { %v2135_v16 = vsub.f32 %v2127_v11, %v2134_v15  ;;  %v2368_v11 = vld [vmem:[%s5390_s15 + $0x30] sm:$0xff]  ;;  %v2377_v15 = vld [vmem:[%s5390_s15 + $0x78] sm:$0xff] }
 0x5bc   : > { %v2136_v17 = vmul.f32 %v2135_v16, %v2135_v16 }
 0x5be   : > { %v2137_v18 = vsel %vm863_vm1, %v2136_v17, 0.0  ;;  %v2375_v17 = vld [vmem:[%s5390_s15 + $0x68] sm:$0xff] }
 0x5bf   : > { %2138 = vadd.xlane.f32.xlu1 %v2137_v18  ;;  %v2374_v18 = vld [vmem:[%s5390_s15 + $0x60] sm:$0xff] }
 0x648   : > { %v2139_v27 = vpop.xlane.xlu1 %2138 }
 0x649   : > { %v2140_v28 = vmul.f32 0.03125, %v2139_v27 }
 0x64b   : > { %v2141_v29 = vadd.f32 1e-05, %v2140_v28 }
 0x64d   : > { %4494 = vrsqrt.f32 %v2141_v29 }
 0x65a   : > { %v4495_v30 = vpop.eup %4494 }
 0x65b   : > { %v2143_v32 = vmul.f32 %v4495_v30, %v2135_v16  ;;  %v2376_v16 = vld [vmem:[%s5390_s15 + $0x70] sm:$0xff]  ;;  %v4017_v30 = vld [vmem:[%s5391_s16 + $0x3] ss:$0 sm:$0xff] }
 0x65d   : > { %v2150_v34 = vmul.f32 %v4006_v31, %v2143_v32 }
 0x65f   : > { %v2157_v35 = vadd.f32 %v4007_v33, %v2150_v34 }
 0x661   : > { %4280 = vmatmul.mubr.msk.f32.vlgmr.msra.gmra.mxu0 %vm863_vm1, %v2157_v35 }
 0x662   : > { %4309 = vmatprep.mubr.msk.f32.mxu0 %vm4581_vm0, %v4580_v1  ;;  %4302 = vmatpush3.msra.mxu0 %v2365_v56 }
 0x663   : > { %4303 = vmatprep.subr.mxu0 %v4580_v1 }
 0x664   : > { %4304 = vmatpush3.msra.mxu0 %v2364_v58 }
 0x665   : > { %4305 = vmatprep.subr.mxu0 %v4580_v1 }
 0x666   : > { %4306 = vmatpush3.msra.mxu0 %v2363_v60 }
 0x667   : > { %4307 = vmatprep.subr.mxu0 %v4580_v1 }
 0x668   : > { %4308 = vmatpush3.msra.mxu0 %v2362_v62 }
 0x669   : > { %4312 = vmatprep.subr.mxu0 %v4580_v1 }
 0x721   : > { %v2238_v40 = vpop.f32.mrf.mxu0 }
 0x722   : > { %v2239_v42 = vadd.f32 %v4008_v39, %v2238_v40 }
 0x723   : > { %v4281_v43 = vpop.f32.mrf.mxu0 }
 0x724   : > { %v2242_v44 = vmax.f32 %v2239_v42, 0.0 }
 0x726   : > { %4299 = vmatmul.mubr.msk.f32.vlgmr.msra.gmra.mxu1 %vm2258_vm3, %v2242_v44 }
 0x727   : > { %4331 = vmatprep.mubr.msk.f32.mxu1 %vm4581_vm0, %v4580_v1  ;;  %4324 = vmatpush3.msra.mxu1 %v2373_v57 }
 0x728   : > { %4325 = vmatprep.subr.mxu1 %v4580_v1 }
 0x729   : > { %4326 = vmatpush3.msra.mxu1 %v2372_v59 }
 0x72a   : > { %4327 = vmatprep.subr.mxu1 %v4580_v1 }
 0x72b   : > { %4328 = vmatpush3.msra.mxu1 %v2371_v61 }
 0x72c   : > { %4329 = vmatprep.subr.mxu1 %v4580_v1 }
 0x72d   : > { %4330 = vmatpush3.msra.mxu1 %v2370_v63 }
 0x72e   : > { %4345 = vmatprep.subr.mxu1 %v4580_v1 }
 0x7e6   : > { %v2328_v46 = vpop.f32.mrf.mxu1 }
 0x7e7   : > { %v2329_v47 = vadd.f32 %v4010_v45, %v2328_v46 }
 0x7e8   : > { %v4300_v48 = vpop.f32.mrf.mxu1 }
 0x7e9   : > { %v2332_v49 = vadd.f32 %v2329_v47, %v2157_v35 }
 0x7eb   : > { %v2335_v50 = vsel %vm863_vm1, %v2332_v49, 0.0 }
 0x7ec   : > { %2336 = vadd.xlane.f32.xlu0 %v2335_v50 }
 0x875   : > { %v2337_v51 = vpop.xlane.xlu0 %2336 }
 0x876   : > { %v2338_v52 = vmul.f32 0.03125, %v2337_v51 }
 0x878   : > { %v2339_v53 = vsub.f32 %v2332_v49, %v2338_v52 }
 0x87a   : > { %v2340_v54 = vmul.f32 %v2339_v53, %v2339_v53 }
 0x87c   : > { %v2341_v55 = vsel %vm863_vm1, %v2340_v54, 0.0 }
 0x87d   : > { %2342 = vadd.xlane.f32.xlu0 %v2341_v55 }
 0x906   : > { %v2343_v0 = vpop.xlane.xlu0 %2342 }
 0x907   : > { %v2344_v2 = vmul.f32 0.03125, %v2343_v0 }
 0x909   : > { %v2345_v3 = vadd.f32 1e-05, %v2344_v2 }
 0x90b   : > { %4496 = vrsqrt.f32 %v2345_v3 }
 0x918   : > { %v4497_v4 = vpop.eup %4496 }
 0x919   : > { %v2347_v6 = vmul.f32 %v4497_v4, %v2339_v53 }
 0x91b   : > { %v2354_v8 = vmul.f32 %v4012_v5, %v2347_v6 }
 0x91d   : > { %v5101_v9 = vadd.f32 %v4013_v7, %v2354_v8 }
 0x91f   : > { %4310 = vmatmul.mubr.msk.f32.vlgmr.msra.gmra.mxu0 %vm863_vm1, %v5101_v9  ;;  %4332 = vmatmul.mubr.msk.f32.vlgmr.msra.gmra.mxu1 %vm863_vm1, %v5101_v9 }
 0x920   : > { %4313 = vmatpush3.msra.mxu0 %v2369_v10  ;;  %4320 = vmatprep.mubr.msk.f32.mxu0 %vm4581_vm0, %v4580_v1 }
 0x921   : > { %4314 = vmatprep.subr.mxu0 %v4580_v1  ;;  %4347 = vmatprep.mubr.msk.f32.mxu1 %vm4581_vm0, %v4580_v1 }
 0x922   : > { %4315 = vmatpush3.msra.mxu0 %v2368_v11 }
 0x923   : > { %4316 = vmatprep.subr.mxu0 %v4580_v1 }
 0x924   : > { %4317 = vmatpush3.msra.mxu0 %v2367_v13 }
 0x925   : > { %4318 = vmatprep.subr.mxu0 %v4580_v1 }
 0x926   : > { %4319 = vmatpush3.msra.mxu0 %v2366_v14 }
 0x927   : > { %4321 = vmatmul.mubr.msk.f32.vlgmr.msra.gmra.mxu0 %vm863_vm1, %v5101_v9  ;;  %4334 = vmatprep.subr.mxu0 %v4580_v1 }
 0x928   : > { %4335 = vmatpush3.msra.mxu0 %v2377_v15  ;;  %4342 = vmatprep.mubr.msk.f32.mxu0 %vm4581_vm0, %v4580_v1 }
 0x929   : > { %4336 = vmatprep.subr.mxu0 %v4580_v1 }
 0x92a   : > { %4337 = vmatpush3.msra.mxu0 %v2376_v16 }
 0x92b   : > { %4338 = vmatprep.subr.mxu0 %v4580_v1 }
 0x92c   : > { %4339 = vmatpush3.msra.mxu0 %v2375_v17 }
 0x92d   : > { %4340 = vmatprep.subr.mxu0 %v4580_v1 }
 0x92e   : > { %4341 = vmatpush3.msra.mxu0 %v2374_v18 }
 0x92f   : > { %4343 = vmatmul.mubr.msk.f32.vlgmr.msra.gmra.mxu0 %vm863_vm1, %v5101_v9  ;;  %4355 = vmatprep.subr.mxu0 %v4580_v1 }
 0x930   : > { %4357 = vmatprep.mubr.msk.f32.mxu0 %vm4581_vm0, %v4580_v1 }
 0x9df   : > { %v2475_v20 = vpop.f32.mrf.mxu0  ;;  %v2615_v12 = vpop.f32.mrf.mxu1 }
 0x9e0   : > { %v2476_v21 = vadd.f32 %v4014_v19, %v2475_v20  ;;  %v5158_v25 = vadd.f32 %v4016_v22, %v2615_v12 }
 0x9e1   : > { %v4311_v23 = vpop.f32.mrf.mxu0  ;;  %v4333_v24 = vpop.f32.mrf.mxu1 }
 0x9e2   : > { %2690 = vrot.lane.b32.xlu1 %v2476_v21, %s5463_s7 }
 0x9e6   : > { %2844 = vrot.lane.b32.xlu1 %v5158_v25, %s5463_s7 }
 0x9e7   : > { %v2545_v27 = vpop.f32.mrf.mxu0 }
 0x9e8   : > { %v5165_v28 = vadd.f32 %v4015_v26, %v2545_v27 }
 0x9e9   : > { %v4322_v29 = vpop.f32.mrf.mxu0 }
 0x9ea   : > { %2767 = vrot.lane.b32.xlu0 %v5165_v28, %s5463_s7 }
 0x9ef   : > { %v2685_v31 = vpop.f32.mrf.mxu0 }
 0x9f0   : > { %v5172_v32 = vadd.f32 %v4017_v30, %v2685_v31 }
 0x9f1   : > { %v4344_v33 = vpop.f32.mrf.mxu0 }
 0x9f2   : > { %2921 = vrot.lane.b32.xlu1 %v5172_v32, %s5463_s7 }
 0xa54   : > { %v2691_v34 = vpop.permute.xlu1 %2690 }
 0xa55   : > { %4346 = vmatpush3.xpose.msk.msra.mxu1 %vm1150_vm2, %v2691_v34 }
 0xa56   : > { %4350 = vmatprep.subr.mxu1 %v4580_v1 }
 0xa58   : > { %4348 = vmatmul.mubr.msk.f32.vlgmr.msra.gmra.mxu1 %vm1150_vm2, %v2476_v21  ;;  %v2845_v35 = vpop.permute.xlu1 %2844 }
 0xa59   : > { %4356 = vmatpush3.xpose.msk.msra.mxu0 %vm1150_vm2, %v2845_v35  ;;  %4352 = vmatprep.mubr.msk.f32.mxu1 %vm4581_vm0, %v4580_v1 }
 0xa5a   : > { %4365 = vmatprep.subr.mxu0 %v4580_v1 }
 0xa5c   : > { %v2768_v36 = vpop.permute.xlu0 %2767  ;;  %4358 = vmatmul.mubr.msk.f32.vlgmr.msra.gmra.mxu0 %vm1150_vm2, %v5158_v25 }
 0xa5d   : > { %4351 = vmatpush3.xpose.msk.msra.mxu1 %vm1150_vm2, %v2768_v36  ;;  %4367 = vmatprep.mubr.msk.f32.mxu0 %vm4581_vm0, %v4580_v1 }
 0xa5e   : > { %4360 = vmatprep.subr.mxu1 %v4580_v1 }
 0xa60   : > { %4353 = vmatmul.mubr.msk.f32.vlgmr.msra.gmra.mxu1 %vm1150_vm2, %v5165_v28 }
 0xa61   : > { %4362 = vmatprep.mubr.msk.f32.mxu1 %vm4581_vm0, %v4580_v1 }
 0xa64   : > { %v2922_v37 = vpop.permute.xlu1 %2921 }
 0xa65   : > { %4361 = vmatpush3.xpose.msk.msra.mxu1 %vm1150_vm2, %v2922_v37 }
 0xa66   : > { %4370 = vmatprep.subr.mxu1 %v4580_v1 }
 0xa68   : > { %4363 = vmatmul.mubr.msk.f32.vlgmr.msra.gmra.mxu1 %vm1150_vm2, %v5172_v32 }
 0xa69   : > { %4372 = vmatprep.mubr.msk.f32.mxu1 %vm4581_vm0, %v4580_v1 }
 0xb18   : > { %v2762_v38 = vpop.f32.mrf.mxu1 }
 0xb19   : > { %v2763_v39 = vadd.f32 %v2762_v38, %v4920_v41 }
 0xb1a   : > { %v4349_v40 = vpop.f32.mrf.mxu1 }
 0xb1b   : > { %v2997_v42 = vsel %vm1150_vm2, %v2763_v39, -inf  ;;  %v3357_v40 = vld [vmem:[%s5392_s17] sm:$0xff] }
 0xb1c   : > { %2998 = vmax.xlane.f32.xlu0 %v2997_v42  ;;  %v2916_v43 = vpop.f32.mrf.mxu0  ;;  %v3358_v42 = vld [vmem:[%s5392_s17 + $0x8] sm:$0xff] }
 0xb1d   : > { %v2917_v44 = vadd.f32 %v2916_v43, %v4920_v41  ;;  %v3359_v43 = vld [vmem:[%s5392_s17 + $0x10] sm:$0xff] }
 0xb1e   : > { %v4359_v45 = vpop.f32.mrf.mxu0 }
 0xb1f   : > { %v3003_v46 = vsel %vm1150_vm2, %v2917_v44, -inf }
 0xb20   : > { %v2839_v47 = vpop.f32.mrf.mxu1  ;;  %3004 = vmax.xlane.f32.xlu0 %v3003_v46 }
 0xb21   : > { %v2840_v48 = vadd.f32 %v2839_v47, %v4920_v41 }
 0xb22   : > { %v4354_v49 = vpop.f32.mrf.mxu1 }
 0xb23   : > { %v3000_v50 = vsel %vm1150_vm2, %v2840_v48, -inf }
 0xb24   : > { %3001 = vmax.xlane.f32.xlu1 %v3000_v50 }
 0xb28   : > { %v2993_v51 = vpop.f32.mrf.mxu1 }
 0xb29   : > { %v2994_v52 = vadd.f32 %v2993_v51, %v4920_v41 }
 0xb2a   : > { %v4364_v53 = vpop.f32.mrf.mxu1 }
 0xb2b   : > { %v3006_v54 = vsel %vm1150_vm2, %v2994_v52, -inf }
 0xb2c   : > { %3007 = vmax.xlane.f32.xlu0 %v3006_v54 }
 0xb35   : > { %3053 = vrot.lane.b32.xlu1 %v2476_v21, %s5464_s6 }
 0xba5   : > { %v2999_v55 = vpop.xlane.xlu0 %2998 }
 0xba6   : > { %v3009_v56 = vsub.f32 %v2763_v39, %v2999_v55 }
 0xba8   : > { %v3013_v57 = vmul.f32 1.442695, %v3009_v56 }
 0xba9   : > { %v3005_v58 = vpop.xlane.xlu0 %3004 }
 0xbaa   : > { %4498 = vpow2.f32 %v3013_v57  ;;  %v3011_v59 = vsub.f32 %v2917_v44, %v3005_v58 }
 0xbac   : > { %v3017_v60 = vmul.f32 1.442695, %v3011_v59 }
 0xbad   : > { %v3002_v61 = vpop.xlane.xlu1 %3001 }
 0xbae   : > { %4500 = vpow2.f32 %v3017_v60  ;;  %v3010_v62 = vsub.f32 %v2840_v48, %v3002_v61  ;;  %v3360_v48 = vld [vmem:[%s5392_s17 + $0x18] sm:$0xff] }
 0xbb0   : > { %v3015_v63 = vmul.f32 1.442695, %v3010_v62 }
 0xbb1   : > { %v3054_v0 = vpop.permute.xlu1 %3053 }
 0xbb2   : > { %4502 = vpow2.f32 %v3015_v63  ;;  %4366 = vmatpush3.msra.mxu0 %v3054_v0 }
 0xbb3   : > { %4375 = vmatprep.subr.mxu0 %v4580_v1 }
 0xbb5   : > { %v3008_v41 = vpop.xlane.xlu0 %3007 }
 0xbb6   : > { %v3012_v2 = vsub.f32 %v2994_v52, %v3008_v41 }
 0xbb7   : > { %v4499_v3 = vpop.eup %4498 }
 0xbb8   : > { %v3019_v4 = vmul.f32 1.442695, %v3012_v2  ;;  %v3021_v5 = vsel %vm1150_vm2, %v4499_v3, 0.0  ;;  %v4038_v2 = vld [vmem:[%s5393_s18] ss:$0 sm:$0xff] }
 0xbb9   : > { %3022 = vadd.xlane.f32.xlu1 %v3021_v5 }
 0xbba   : > { %4504 = vpow2.f32 %v3019_v4 }
 0xbbb   : > { %v4501_v6 = vpop.eup %4500 }
 0xbbc   : > { %v3027_v7 = vsel %vm1150_vm2, %v4501_v6, 0.0 }
 0xbbd   : > { %3028 = vadd.xlane.f32.xlu1 %v3027_v7 }
 0xbbf   : > { %v4503_v8 = vpop.eup %4502 }
 0xbc0   : > { %v3024_v10 = vsel %vm1150_vm2, %v4503_v8, 0.0 }
 0xbc1   : > { %3025 = vadd.xlane.f32.xlu0 %v3024_v10 }
 0xbc7   : > { %v4505_v11 = vpop.eup %4504 }
 0xbc8   : > { %v3030_v13 = vsel %vm1150_vm2, %v4505_v11, 0.0 }
 0xbc9   : > { %3031 = vadd.xlane.f32.xlu0 %v3030_v13 }
 0xbce   : > { %3205 = vrot.lane.b32.xlu1 %v5158_v25, %s5464_s6 }
 0xbd2   : > { %3281 = vrot.lane.b32.xlu1 %v5172_v32, %s5464_s6 }
 0xbdf   : > { %3129 = vrot.lane.b32.xlu0 %v5165_v28, %s5464_s6  ;;  %s809_s6 = scalar_lea.vmem [#allocation2], %s3979_s3 }
 0xbe0   : > { %s3916_s11 = sshll.u32 %s809_s6, 4  ;;  %s3917_s11 = int_to_ptr.vmem [resolvable:$true] %s3916_s11 }
 0xbe1   : > { %s4518_s7 = scalar_lea.vmem %s3917_s11, 128  ;;  %p4525_p0 = scmp.lt.s32.totalorder %s3917_s11, %s4523_s8 }
 0xbe2   : > { %p4519_p11 = scmp.ne.s32.totalorder %s3917_s11, %s4518_s7  ;;  %p4526_p1 = scmp.lt.s32.totalorder %s4524_s9, %s4518_s7 }
 0xbe4   : > { %p4520_p12 = pnand %p4519_p11, %p4763_p5  ;;  %p4527_p2 = por %p4526_p1, %p4525_p0 }
 0xbe6   : > { %p4521_p13 = pneg %p4520_p12 }
 0xbe8   : > { %p4528_p3 = pnand %p4527_p2, %p4521_p13 }
 0xc42   : > { %v3023_v14 = vpop.xlane.xlu1 %3022 }
 0xc43   : > { %4506 = vrcp.f32 %v3023_v14 }
 0xc46   : > { %v3029_v15 = vpop.xlane.xlu1 %3028 }
 0xc47   : > { %4508 = vrcp.f32 %v3029_v15 }
 0xc4a   : > { %v3026_v16 = vpop.xlane.xlu0 %3025  ;;  %v3206_v29 = vpop.permute.xlu1 %3205 }
 0xc4b   : > { %4510 = vrcp.f32 %v3026_v16 }
 0xc4e   : > { %v3282_v35 = vpop.permute.xlu1 %3281 }
 0xc50   : > { %v4507_v17 = vpop.eup %4506 }
 0xc51   : > { %v3037_v18 = vmul.f32 %v4507_v17, %v3023_v14 }
 0xc52   : > { %v3032_v19 = vpop.xlane.xlu0 %3031 }
 0xc53   : > { %v3041_v20 = vsub.f32 2.0, %v3037_v18  ;;  %4512 = vrcp.f32 %v3032_v19  ;;  %v3790_v18 = vld [vmem:[%s5396_s21 + $0x38] sm:$0xff] }
 0xc54   : > { %v4509_v12 = vpop.eup %4508 }
 0xc55   : > { %v3045_v21 = vmul.f32 %v4507_v17, %v3041_v20  ;;  %v3039_v22 = vmul.f32 %v4509_v12, %v3029_v15  ;;  %v3701_v15 = vld [vmem:[%s5394_s19 + $0x18] sm:$0xff]  ;;  %v3698_v17 = vld [vmem:[%s5394_s19] sm:$0xff]  ;;  %v3788_v20 = vld [vmem:[%s5396_s21 + $0x28] sm:$0xff] }
 0xc56   : > { %v3130_v23 = vpop.permute.xlu0 %3129 }
 0xc57   : > { %v3049_v24 = vmul.f32 %v4499_v3, %v3045_v21  ;;  %v3043_v25 = vsub.f32 2.0, %v3039_v22  ;;  %4371 = vmatpush3.msra.mxu1 %v3130_v23  ;;  %v3786_v21 = vld [vmem:[%s5396_s21 + $0x18] sm:$0xff] }
 0xc58   : > { %v4511_v26 = vpop.eup %4510  ;;  %4380 = vmatprep.subr.mxu1 %v4580_v1 }
 0xc59   : > { %v3047_v27 = vmul.f32 %v4509_v12, %v3043_v25  ;;  %v3038_v28 = vmul.f32 %v4511_v26, %v3026_v16  ;;  %4368 = vmatmul.mubr.msk.f32.vlgmr.msra.gmra.mxu0 %vm1150_vm2, %v3049_v24  ;;  %v3700_v16 = vld [vmem:[%s5394_s19 + $0x10] sm:$0xff]  ;;  %v3787_v12 = vld [vmem:[%s5396_s21 + $0x20] sm:$0xff] }
 0xc5a   : > { %4376 = vmatpush3.msra.mxu0 %v3206_v29  ;;  %4377 = vmatprep.mubr.msk.f32.mxu0 %vm4581_vm0, %v4580_v1 }
 0xc5b   : > { %v3051_v30 = vmul.f32 %v4501_v6, %v3047_v27  ;;  %v3042_v31 = vsub.f32 2.0, %v3038_v28  ;;  %4385 = vmatprep.subr.mxu0 %v4580_v1  ;;  %v4040_v28 = vld [vmem:[%s5399_s24] ss:$0 sm:$0xff] }
 0xc5d   : > { %v3046_v32 = vmul.f32 %v4511_v26, %v3042_v31  ;;  %4378 = vmatmul.mubr.msk.f32.vlgmr.msra.gmra.mxu0 %vm1150_vm2, %v3051_v30  ;;  %v4039_v26 = vld [vmem:[%s5398_s23] ss:$0 sm:$0xff]  ;;  %v3785_v31 = vld [vmem:[%s5396_s21 + $0x10] sm:$0xff] }
 0xc5e   : > { %4387 = vmatprep.mubr.msk.f32.mxu0 %vm4581_vm0, %v4580_v1  ;;  %4386 = vmatpush3.msra.mxu0 %v3357_v40 }
 0xc5f   : > { %v3050_v33 = vmul.f32 %v4503_v8, %v3046_v32  ;;  %4395 = vmatprep.subr.mxu0 %v4580_v1  ;;  %v3784_v32 = vld [vmem:[%s5396_s21 + $0x8] sm:$0xff] }
 0xc60   : > { %v4513_v34 = vpop.eup %4512 }
 0xc61   : > { %v3040_v36 = vmul.f32 %v4513_v34, %v3032_v19  ;;  %4373 = vmatmul.mubr.msk.f32.vlgmr.msra.gmra.mxu1 %vm1150_vm2, %v3050_v33  ;;  %v3789_v19 = vld [vmem:[%s5396_s21 + $0x30] sm:$0xff]  ;;  %v3783_v33 = vld [vmem:[%s5396_s21] sm:$0xff] }
 0xc62   : > { %4381 = vmatpush3.msra.mxu1 %v3282_v35  ;;  %4382 = vmatprep.mubr.msk.f32.mxu1 %vm4581_vm0, %v4580_v1 }
 0xc63   : > { %v3044_v37 = vsub.f32 2.0, %v3040_v36  ;;  %4390 = vmatprep.subr.mxu1 %v4580_v1 }
 0xc65   : > { %v3048_v38 = vmul.f32 %v4513_v34, %v3044_v37  ;;  %v4041_v34 = vld [vmem:[%s5395_s20] ss:$0 sm:$0xff] }
 0xc67   : > { %v3052_v39 = vmul.f32 %v4505_v11, %v3048_v38 }
 0xc69   : > { %4383 = vmatmul.mubr.msk.f32.vlgmr.msra.gmra.mxu1 %vm1150_vm2, %v3052_v39  ;;  %v4043_v39 = vld [vmem:[%s5397_s22] ss:$0 sm:$0xff] }
 0xc6a   : > { %4392 = vmatprep.mubr.msk.f32.mxu1 %vm4581_vm0, %v4580_v1  ;;  %4391 = vmatpush3.msra.mxu1 %v3358_v42 }
 0xc6b   : > { %4400 = vmatprep.subr.mxu1 %v4580_v1 }
 0xd19   : > { %v3125_v44 = vpop.f32.mrf.mxu0 }
 0xd1a   : > { %4388 = vmatmul.mubr.msk.f32.vlgmr.msra.gmra.mxu0 %vm1150_vm2, %v3125_v44 }
 0xd1b   : > { %v4369_v45 = vpop.f32.mrf.mxu0  ;;  %4396 = vmatpush3.msra.mxu0 %v3359_v43  ;;  %4397 = vmatprep.mubr.msk.f32.mxu0 %vm4581_vm0, %v4580_v1 }
 0xd1c   : > { %4405 = vmatprep.subr.mxu0 %v4580_v1 }
 0xd1d   : > { %v3277_v46 = vpop.f32.mrf.mxu0 }
 0xd1e   : > { %4398 = vmatmul.mubr.msk.f32.vlgmr.msra.gmra.mxu0 %vm1150_vm2, %v3277_v46 }
 0xd1f   : > { %v4379_v47 = vpop.f32.mrf.mxu0  ;;  %4413 = vmatprep.mubr.msk.f32.mxu0 %vm4581_vm0, %v4580_v1  ;;  %4406 = vmatpush3.msra.mxu0 %v3701_v15 }
 0xd20   : > { %4407 = vmatprep.subr.mxu0 %v4580_v1 }
 0xd21   : > { %v3201_v49 = vpop.f32.mrf.mxu1  ;;  %4408 = vmatpush3.msra.mxu0 %v3700_v16 }
 0xd22   : > { %4393 = vmatmul.mubr.msk.f32.vlgmr.msra.gmra.mxu1 %vm1150_vm2, %v3201_v49  ;;  %4409 = vmatprep.subr.mxu0 %v4580_v1 }
 0xd23   : > { %v4374_v50 = vpop.f32.mrf.mxu1  ;;  %4401 = vmatpush3.msra.mxu1 %v3360_v48  ;;  %4402 = vmatprep.mubr.msk.f32.mxu1 %vm4581_vm0, %v4580_v1 }
 0xd24   : > { %4416 = vmatprep.subr.mxu1 %v4580_v1 }
 0xd29   : > { %v3353_v51 = vpop.f32.mrf.mxu1 }
 0xd2a   : > { %4403 = vmatmul.mubr.msk.f32.vlgmr.msra.gmra.mxu1 %vm1150_vm2, %v3353_v51 }
 0xd2b   : > { %v4384_v52 = vpop.f32.mrf.mxu1  ;;  %4432 = vmatprep.mubr.msk.f32.mxu1 %vm4581_vm0, %v4580_v1  ;;  %4417 = vmatpush3.msra.mxu1 %v3790_v18 }
 0xd2c   : > { %4418 = vmatprep.subr.mxu1 %v4580_v1 }
 0xd2d   : > { %4419 = vmatpush3.msra.mxu1 %v3789_v19 }
 0xd2e   : > { %4420 = vmatprep.subr.mxu1 %v4580_v1 }
 0xd2f   : > { %4421 = vmatpush3.msra.mxu1 %v3788_v20 }
 0xd30   : > { %4422 = vmatprep.subr.mxu1 %v4580_v1 }
 0xd31   : > { %4423 = vmatpush3.msra.mxu1 %v3787_v12 }
 0xd32   : > { %4424 = vmatprep.subr.mxu1 %v4580_v1 }
 0xd33   : > { %4425 = vmatpush3.msra.mxu1 %v3786_v21 }
 0xd34   : > { %4426 = vmatprep.subr.mxu1 %v4580_v1 }
 0xd35   : > { %4427 = vmatpush3.msra.mxu1 %v3785_v31 }
 0xd36   : > { %4428 = vmatprep.subr.mxu1 %v4580_v1 }
 0xd37   : > { %4429 = vmatpush3.msra.mxu1 %v3784_v32 }
 0xd38   : > { %4430 = vmatprep.subr.mxu1 %v4580_v1 }
 0xd39   : > { %4431 = vmatpush3.msra.mxu1 %v3783_v33 }
 0xdda   : > { %v3430_v53 = vpop.f32.mrf.mxu0 }
 0xddb   : > { %v3653_v60 = vsel %vm863_vm1, %v3430_v53, 0.0 }
 0xddc   : > { %v4389_v54 = vpop.f32.mrf.mxu0 }
 0xddd   : > { %v4045_v54 = vld [vmem:[%s5400_s25] ss:$0 sm:$0xff] }
 0xdde   : > { %v3576_v55 = vpop.f32.mrf.mxu0 }
 0xddf   : > { %v3656_v62 = vsel %vm863_vm1, %v3576_v55, 0.0 }
 0xde0   : > { %v4399_v56 = vpop.f32.mrf.mxu0 }
 0xde1   : > { %v4046_v56 = vld [vmem:[%s5401_s26] ss:$0 sm:$0xff] }
 0xde2   : > { %v3503_v57 = vpop.f32.mrf.mxu1 }
 0xde3   : > { %v3654_v58 = vsel %vm863_vm1, %v3503_v57, 0.0 }
 0xde4   : > { %v4394_v59 = vpop.f32.mrf.mxu1  ;;  %v3655_v61 = vadd.f32 %v3654_v58, %v3653_v60 }
 0xde6   : > { %v3657_v0 = vadd.f32 %v3656_v62, %v3655_v61 }
 0xdea   : > { %v3649_v63 = vpop.f32.mrf.mxu1 }
 0xdeb   : > { %v3658_v41 = vsel %vm863_vm1, %v3649_v63, 0.0 }
 0xdec   : > { %v3659_v3 = vadd.f32 %v3658_v41, %v3657_v0  ;;  %v4404_v4 = vpop.f32.mrf.mxu1 }
 0xdee   : > { %v3667_v5 = vadd.f32 %v4038_v2, %v3659_v3 }
 0xdf0   : > { %v3668_v6 = vadd.f32 %v3667_v5, %v5101_v9  ;;  %v3699_v9 = vld [vmem:[%s5394_s19 + $0x8] sm:$0xff] }
 0xdf1   : > { %4410 = vmatpush3.msra.mxu0 %v3699_v9 }
 0xdf2   : > { %v3671_v7 = vsel %vm863_vm1, %v3668_v6, 0.0  ;;  %4411 = vmatprep.subr.mxu0 %v4580_v1 }
 0xdf3   : > { %3672 = vadd.xlane.f32.xlu0 %v3671_v7  ;;  %4412 = vmatpush3.msra.mxu0 %v3698_v17 }
 0xe7c   : > { %v3673_v8 = vpop.xlane.xlu0 %3672 }
 0xe7d   : > { %v3674_v10 = vmul.f32 0.03125, %v3673_v8 }
 0xe7f   : > { %v3675_v11 = vsub.f32 %v3668_v6, %v3674_v10 }
 0xe81   : > { %v3676_v13 = vmul.f32 %v3675_v11, %v3675_v11 }
 0xe83   : > { %v3677_v14 = vsel %vm863_vm1, %v3676_v13, 0.0 }
 0xe84   : > { %3678 = vadd.xlane.f32.xlu1 %v3677_v14 }
 0xf0d   : > { %v3679_v22 = vpop.xlane.xlu1 %3678 }
 0xf0e   : > { %v3680_v23 = vmul.f32 0.03125, %v3679_v22 }
 0xf10   : > { %v3681_v24 = vadd.f32 1e-05, %v3680_v23 }
 0xf12   : > { %4514 = vrsqrt.f32 %v3681_v24 }
 0xf1f   : > { %v4515_v25 = vpop.eup %4514 }
 0xf20   : > { %v3683_v27 = vmul.f32 %v4515_v25, %v3675_v11 }
 0xf22   : > { %v3690_v29 = vmul.f32 %v4039_v26, %v3683_v27 }
 0xf24   : > { %v3697_v30 = vadd.f32 %v4040_v28, %v3690_v29 }
 0xf26   : > { %4414 = vmatmul.mubr.msk.f32.vlgmr.msra.gmra.mxu0 %vm863_vm1, %v3697_v30 }
 0xfe6   : > { %v3778_v35 = vpop.f32.mrf.mxu0 }
 0xfe7   : > { %v3779_v36 = vadd.f32 %v4041_v34, %v3778_v35 }
 0xfe8   : > { %v4415_v37 = vpop.f32.mrf.mxu0 }
 0xfe9   : > { %v3782_v38 = vmax.f32 %v3779_v36, 0.0 }
 0xfeb   : > { %4433 = vmatmul.mubr.msk.f32.vlgmr.msra.gmra.mxu1 %vm2258_vm3, %v3782_v38 }
0x10ab   : > { %v3867_v40 = vpop.f32.mrf.mxu1 }
0x10ac   : > { %v3868_v42 = vadd.f32 %v4043_v39, %v3867_v40 }
0x10ad   : > { %v4434_v43 = vpop.f32.mrf.mxu1 }
0x10ae   : > { %v3871_v1 = vadd.f32 %v3868_v42, %v3697_v30 }
0x10b0   : > { %v3874_v44 = vsel %vm863_vm1, %v3871_v1, 0.0 }
0x10b1   : > { %3875 = vadd.xlane.f32.xlu0 %v3874_v44 }
0x113a   : > { %v3876_v45 = vpop.xlane.xlu0 %3875 }
0x113b   : > { %v3877_v46 = vmul.f32 0.03125, %v3876_v45 }
0x113d   : > { %v3878_v47 = vsub.f32 %v3871_v1, %v3877_v46 }
0x113f   : > { %v3879_v48 = vmul.f32 %v3878_v47, %v3878_v47 }
0x1141   : > { %v3880_v49 = vsel %vm863_vm1, %v3879_v48, 0.0 }
0x1142   : > { %3881 = vadd.xlane.f32.xlu0 %v3880_v49 }
0x11cb   : > { %v3882_v50 = vpop.xlane.xlu0 %3881 }
0x11cc   : > { %v3883_v51 = vmul.f32 0.03125, %v3882_v50 }
0x11ce   : > { %v3884_v52 = vadd.f32 1e-05, %v3883_v51 }
0x11d0   : > { %4516 = vrsqrt.f32 %v3884_v52 }
0x11dd   : > { %v4517_v53 = vpop.eup %4516 }
0x11de   : > { %v3886_v55 = vmul.f32 %v4517_v53, %v3878_v47 }
0x11e0   : > { %v3893_v57 = vmul.f32 %v4045_v54, %v3886_v55 }
0x11e2   : > { %v3900_v58 = vadd.f32 %v4046_v56, %v3893_v57 }
0x11e4   : > { %3901 = vst.msk [vmem:[%s809_s6] sm:$0xff] %vm863_vm1, %v3900_v58 }
0x11e5   : > { %4531 = shalt.err (!%p4528_p3)
}
0x11e6   : > { %s4532_s10 = scalar_lea.hbm %s3914_s13, 128  ;;  %s4536_s30 = scalar_lea.hbm %s5465_s12, 256 }
0x11e7   : > { %p4533_p4 = scmp.ne.s32.totalorder %s3914_s13, %s4532_s10  ;;  %p4537_p9 = scmp.lt.s32.totalorder %s3914_s13, %s5465_s12 }
0x11e8   : > { %p4538_p10 = scmp.lt.s32.totalorder %s4536_s30, %s4532_s10 }
0x11e9   : > { %p4534_p7 = pnand %p4533_p4, %p4763_p5 }
0x11ea   : > { %p4539_p11 = por %p4538_p10, %p4537_p9 }
0x11eb   : > { %p4535_p8 = pneg %p4534_p7 }
0x11ed   : > { %p4540_p12 = pnand %p4539_p11, %p4535_p8 }
0x11ef   : > { %4543 = shalt.err (!%p4540_p12)
}
0x11f0   : > { %4435 = dma.vmem_to_hbm [thread:$0]  (%p4763_p5), %s3917_s11, 128, %s3914_s13, %s3903_s14  }
0x11f1 PF: > { %s5466_s28 = sld [smem:[#allocation7_spill]] }
0x11f2   : > { %s5467_s7 = sld [smem:[#allocation5_spill]] }
0x11f7   : > { %p4441_p13 = scmp.ge.s32.totalorder %s5466_s28, 2 }
0x11f8   : > { %s3928_s8 = sand.u32 1, %s5467_s7  }
0x11f9   : > { %p4438_p0 = pnand %p4441_p13, %p4767_p6  ;;  %s3929_s9 = scalar_lea.sflag [#allocation3], %s3928_s8 }
0x11fb   : > { %p4439_p1 = pneg %p4438_p0 }
0x11fd   : > { %4561 = dma.done.wait (%p4439_p1), %s3929_s9, 128  }
0x11fe   : > { %4563 = vsyncadd (%p4439_p1), %s3929_s9, 4294967168  ;;  %s5469_s30 = sld [smem:[#allocation8_spill]]  ;;  %s5472_s7 = smov %s4570_s4 }
0x11ff   : > { %s5470_s10 = sld [smem:[#allocation6_spill]] }
0x1200   : > { %s5471_s8 = sld [smem:[#allocation9_spill]] }
0x1204   : > { %p37_p2 = scmp.ge.s32.totalorder %s5469_s30, 4  }
0x1205   : > { %s5473_s4 = smov %s5470_s10 }
0x1206   :  { %39 = sbr.rel (!%p37_p2) target bundleno = 20 (0x14), region = 163 }
0x120b   :  { %3934 = vsyncpa [#allocation3], 1 }
0x120c   :  { %3936 = vsyncpa [#allocation3 + $0x1], 1 }

</bundles_post_ra>
